<compile_context>
chip_gen: v5e
topology: v5e:2x2
jax: 0.10.0
libtpu: 0.0.40
codegen_flags: <defaults>
</compile_context>

<pallas_src>
from functools import partial

import jax
import jax.numpy as jnp
from jax.experimental import pallas as pl
from jax.experimental.pallas import tpu as pltpu


def _round_up(x, m):
    return (x + m - 1) // m * m


def _vmem_capacity_bytes():
    """Physical VMEM per TensorCore; conservative fallback if the query fails."""
    try:
        info = pltpu.get_tpu_info()
        cap = int(getattr(info, "vmem_capacity_bytes", 0) or 0)
        if cap > 0:
            return cap
    except Exception:
        pass
    return 64 * 1024 * 1024   # v7x per-TC VMEM: a safe lower bound for all gens


def _conv_kernel(params_ref, x_ref, out_ref, *scratch, hk, wk, padding, stride):
    # params_ref: (hk*wk + 1,) f32 in SMEM: [Ksum.ravel(), bias * bk*ck*hk*wk]
    #             (grid-invariant operand, copied HBM->SMEM once before the grid)
    # x_ref:      (H, W, TN)           VMEM, lane-dense: TN (b,c) planes on lanes
    # out_ref:    (h_out, w_out, TN)   VMEM
    # scratch[0]: (H+2p, W+2p, TN)     VMEM, present only when padding > 0
    hx, wx, tn = x_ref.shape
    h_out, w_out, _ = out_ref.shape

    if padding > 0:
        p = padding
        xpad_ref = scratch[0]
        hp, wp, _ = xpad_ref.shape
        # Border-only zeroing: the interior is fully overwritten by the copy
        # below, so only the p-wide frame needs zeros (O(p*perimeter) instead
        # of O(area)).  Must happen every step (parallel grid sharding on v7x
        # means a core may never execute step 0).
        zrow = jnp.zeros((p, wp, tn), dtype=jnp.float32)
        xpad_ref[0:p, :, :] = zrow
        xpad_ref[hp - p:hp, :, :] = zrow
        zcol = jnp.zeros((hx, p, tn), dtype=jnp.float32)
        xpad_ref[p:p + hx, 0:p, :] = zcol
        xpad_ref[p:p + hx, wp - p:wp, :] = zcol
        # Interior copy: offsets land on outer (H) / sublane (W) axes only,
        # lanes untouched -> cheap VMEM copy, no cross-lane shifted stores,
        # and no wrapper-side jnp.pad HBM pass.
        xpad_ref[p:p + hx, p:p + wx, :] = x_ref[...]
        src = xpad_ref
    else:
        src = x_ref

    bias = params_ref[hk * wk]
    # Bias-initialized accumulator (saves one full-tile VPU add per block).
    acc = jnp.full((h_out, w_out, tn), bias, dtype=jnp.float32)

    # Hot path: hk*wk shifted-slab multiply-adds on the VPU.  Tap shifts are
    # on the outer (i) and sublane (j) axes; the lane axis carries TN
    # independent (b,c) planes, so every vreg / output store is lane-dense.
    for i in range(hk):
        for j in range(wk):
            acc = acc + src[i:i + h_out, j:j + w_out, :] * params_ref[i * wk + j]

    if stride > 1:
        # PyTorch loop semantics: only output indices that are multiples of
        # `stride` are written; everything else stays zero.
        hi = jax.lax.broadcasted_iota(jnp.int32, (h_out, w_out, tn), 0)
        wi = jax.lax.broadcasted_iota(jnp.int32, (h_out, w_out, tn), 1)
        if stride & (stride - 1) == 0:       # power of two: & instead of %
            m = stride - 1
            keep = ((hi & m) == 0) & ((wi & m) == 0)
        else:
            keep = ((hi % stride) == 0) & ((wi % stride) == 0)
        acc = jnp.where(keep, acc, 0.0)

    out_ref[...] = acc


def conv_forward(X, K, b, padding=0, stride=1, vmem_budget_bytes=None):
    """Pallas equivalent of Conv.forward.  X: (B, C, H, W) NCHW."""
    bx, cx, hx, wx = X.shape
    bk, ck, hk, wk = K.shape
    h_out = (hx - hk + 2 * padding) // stride + 1
    w_out = (wx - wk + 2 * padding) // stride + 1
    hp, wp = hx + 2 * padding, wx + 2 * padding
    n = bx * cx

    b_arr = jnp.asarray(b, dtype=jnp.float32)
    assert b_arr.size == 1, "Conv module uses a single scalar bias parameter"

    # Lane-dense relayout: (B, C, H, W) -> (H, W, N), N = B*C on the lane axis.
    # Wrapper-side layout plumbing so the kernel's vregs / stores are dense.
    Xr = jnp.transpose(X.astype(jnp.float32).reshape(n, hx, wx), (1, 2, 0))

    # Fold the (bk, ck) broadcast-sum into hk*wk taps + one bias constant,
    # packed as a single flat 1-D f32 array (1-D avoids SMEM 2-D padding).
    ksum = jnp.sum(K.astype(jnp.float32), axis=(0, 1)).reshape(-1)        # (hk*wk,)
    bias_const = b_arr.reshape(-1)[:1] * jnp.float32(bk * ck * hk * wk)   # (1,)
    params = jnp.concatenate([ksum, bias_const])                          # (hk*wk+1,)

    # --- VMEM budgeting (generation-aware) ----------------------------------
    vmem_cap = _vmem_capacity_bytes()
    if vmem_budget_bytes is None:
        # ~1/3 of physical VMEM (v5e/v6e: ~42 MiB, v7x: ~21 MiB) leaves room
        # for compiler-internal scratch and pipeline slack.
        vmem_budget_bytes = min(vmem_cap // 3, 48 << 20)

    def _block_bytes(lanes):
        t = _round_up(max(lanes, 1), 128)                                # lane padding
        byt = 2 * 4 * hx * _round_up(wx, 8) * t                          # input,  double-buffered
        byt += 2 * 4 * h_out * _round_up(max(w_out, 1), 8) * t           # output, double-buffered
        if padding > 0:
            byt += 4 * hp * _round_up(wp, 8) * t                         # padded scratch, single
        return byt

    if n <= 128:
        tn = n                                  # lane block must equal the full dim
    else:
        groups_fit = max(1, vmem_budget_bytes // _block_bytes(128))
        groups_cap = n // 128                   # never exceed the array extent
        if n >= 256:
            # Keep >= 2 grid steps so a 2-TensorCore part (v7x) can split the
            # "parallel" axis; negligible per-step cost on v5e/v6e at this size.
            groups_cap = min(groups_cap, pl.cdiv(pl.cdiv(n, 128), 2))
        tn = 128 * max(1, min(groups_fit, groups_cap))

    est_bytes = _block_bytes(tn)
    vmem_limit = int(max(32 << 20, min(est_bytes + (8 << 20), vmem_cap - (8 << 20))))

    kernel = partial(_conv_kernel, hk=hk, wk=wk, padding=padding, stride=stride)

    scratch_shapes = []
    if padding > 0:
        scratch_shapes.append(pltpu.VMEM((hp, wp, tn), jnp.float32))

    out = pl.pallas_call(
        kernel,
        out_shape=jax.ShapeDtypeStruct((h_out, w_out, n), jnp.float32),
        grid=(pl.cdiv(n, tn),),
        in_specs=[
            # taps + bias: grid-invariant, lives in SMEM for the whole call
            pl.BlockSpec(memory_space=pltpu.MemorySpace.SMEM),
            # image planes: (H, W, TN) lane-dense blocks, auto double-buffered
            pl.BlockSpec((hx, wx, tn), lambda i: (0, 0, i)),
        ],
        out_specs=pl.BlockSpec((h_out, w_out, tn), lambda i: (0, 0, i)),
        scratch_shapes=scratch_shapes,
        compiler_params=pltpu.CompilerParams(
            dimension_semantics=("parallel",),
            vmem_limit_bytes=vmem_limit,
        ),
    )(params, Xr)

    # Back to NCHW.
    return jnp.transpose(out, (2, 0, 1)).reshape(bx, cx, h_out, w_out)


def conv_reference(X, K, b, padding=0, stride=1):
    """Independent pure-JAX reference (lax.conv) for verification."""
    bx, cx, hx, wx = X.shape
    bk, ck, hk, wk = K.shape
    h_out = (hx - hk + 2 * padding) // stride + 1
    w_out = (wx - wk + 2 * padding) // stride + 1
    ksum = jnp.sum(K.astype(jnp.float32), axis=(0, 1))[None, None]        # (1,1,hk,wk)
    Xr = X.astype(jnp.float32).reshape(bx * cx, 1, hx, wx)
    Y = jax.lax.conv_general_dilated(
        Xr, ksum, window_strides=(1, 1),
        padding=[(padding, padding), (padding, padding)])                 # stride-1 conv
    Y = Y[:, 0, :h_out, :w_out]
    bias_const = jnp.reshape(b, ()).astype(jnp.float32) * (bk * ck * hk * wk)
    Y = Y + bias_const
    hi = jnp.arange(h_out)[:, None]
    wi = jnp.arange(w_out)[None, :]
    mask = ((hi % stride) == 0) & ((wi % stride) == 0)
    Y = jnp.where(mask, Y, 0.0)
    return Y.reshape(bx, cx, h_out, w_out)


if __name__ == "__main__":
    key = jax.random.PRNGKey(0)
    kx, kk = jax.random.split(key)

    # Small shapes consistent with the module's forward.
    B, C, H, W = 2, 4, 16, 16
    bk, ck, hk, wk = 2, 3, 3, 3

    X = jax.random.normal(kx, (B, C, H, W), dtype=jnp.float32)
    K = jax.random.normal(kk, (bk, ck, hk, wk), dtype=jnp.float32)
    b = jnp.zeros((1, 1, 1, 1), dtype=jnp.float32)   # module default: zero bias param

    # main config: padding=1, stride=1 (padded-scratch path, full output)
    Z = conv_forward(X, K, b, padding=1, stride=1)
    Z = jax.block_until_ready(Z)
    Z_ref = conv_reference(X, K, b, padding=1, stride=1)
    assert Z.shape == (B, C, 16, 16)
    assert jnp.allclose(Z, Z_ref, atol=1e-4, rtol=1e-4), "mismatch (pad=1, stride=1)"

    # secondary config: padding=0, stride=2 (no-scratch path + stride mask)
    Z2 = conv_forward(X, K, b, padding=0, stride=2)
    Z2 = jax.block_until_ready(Z2)
    Z2_ref = conv_reference(X, K, b, padding=0, stride=2)
    assert Z2.shape == (B, C, 7, 7)
    assert jnp.allclose(Z2, Z2_ref, atol=1e-4, rtol=1e-4), "mismatch (pad=0, stride=2)"

    print("KERNEL_OK")
</pallas_src>

<mosaic_0001>
module attributes {stable_mosaic.version = 11 : i64} {
  func.func @_conv_kernel(%arg0: i32, %arg1: memref<10xf32, #tpu.memory_space<smem>>, %arg2: memref<16x16x8xf32, #tpu.memory_space<vmem>>, %arg3: memref<16x16x8xf32, #tpu.memory_space<vmem>>, %arg4: memref<18x18x8xf32, #tpu.memory_space<vmem>>) attributes {dimension_semantics = [#tpu.dimension_semantics<parallel>], iteration_bounds = array<i64: 1>, scalar_prefetch = 0 : i64, scratch_operands = 1 : i64, tpu.core_type = #tpu.core_type<tc>, window_params = [{transform_indices = @transform_0, window_bounds = array<i64: 10>}, {transform_indices = @transform_1, window_bounds = array<i64: 16, 16, 8>}, {transform_indices = @transform_2, window_bounds = array<i64: 16, 16, 8>}]} {
    %cst = arith.constant 0.000000e+00 : f32
    %0 = vector.broadcast %cst : f32 to vector<1x18x8xf32>
    %c0 = arith.constant 0 : index
    %c0_0 = arith.constant 0 : index
    %c0_1 = arith.constant 0 : index
    %1 = vector.load %arg4[%c0, %c0_0, %c0_1] : memref<18x18x8xf32, #tpu.memory_space<vmem>>, vector<1x18x8xf32>
    tpu.vector_store %arg4[%c0, %c0_0, %c0_1], %0 {strides = array<i32>} : memref<18x18x8xf32, #tpu.memory_space<vmem>>, vector<1x18x8xf32>,
    %c17 = arith.constant 17 : index
    %c0_2 = arith.constant 0 : index
    %c0_3 = arith.constant 0 : index
    %2 = vector.load %arg4[%c17, %c0_2, %c0_3] : memref<18x18x8xf32, #tpu.memory_space<vmem>>, vector<1x18x8xf32>
    tpu.vector_store %arg4[%c17, %c0_2, %c0_3], %0 {strides = array<i32>} : memref<18x18x8xf32, #tpu.memory_space<vmem>>, vector<1x18x8xf32>,
    %cst_4 = arith.constant 0.000000e+00 : f32
    %3 = vector.broadcast %cst_4 : f32 to vector<16x1x8xf32>
    %c1 = arith.constant 1 : index
    %c0_5 = arith.constant 0 : index
    %c0_6 = arith.constant 0 : index
    %4 = vector.load %arg4[%c1, %c0_5, %c0_6] : memref<18x18x8xf32, #tpu.memory_space<vmem>>, vector<16x1x8xf32>
    tpu.vector_store %arg4[%c1, %c0_5, %c0_6], %3 {strides = array<i32>} : memref<18x18x8xf32, #tpu.memory_space<vmem>>, vector<16x1x8xf32>,
    %c1_7 = arith.constant 1 : index
    %c17_8 = arith.constant 17 : index
    %c0_9 = arith.constant 0 : index
    %5 = vector.load %arg4[%c1_7, %c17_8, %c0_9] : memref<18x18x8xf32, #tpu.memory_space<vmem>>, vector<16x1x8xf32>
    tpu.vector_store %arg4[%c1_7, %c17_8, %c0_9], %3 {strides = array<i32>} : memref<18x18x8xf32, #tpu.memory_space<vmem>>, vector<16x1x8xf32>,
    %c0_10 = arith.constant 0 : index
    %c0_11 = arith.constant 0 : index
    %c0_12 = arith.constant 0 : index
    %6 = vector.load %arg2[%c0_10, %c0_11, %c0_12] : memref<16x16x8xf32, #tpu.memory_space<vmem>>, vector<16x16x8xf32>
    %c1_13 = arith.constant 1 : index
    %c1_14 = arith.constant 1 : index
    %c0_15 = arith.constant 0 : index
    %7 = vector.load %arg4[%c1_13, %c1_14, %c0_15] : memref<18x18x8xf32, #tpu.memory_space<vmem>>, vector<16x16x8xf32>
    tpu.vector_store %arg4[%c1_13, %c1_14, %c0_15], %6 {strides = array<i32>} : memref<18x18x8xf32, #tpu.memory_space<vmem>>, vector<16x16x8xf32>,
    %c9 = arith.constant 9 : index
    %8 = memref.load %arg1[%c9] : memref<10xf32, #tpu.memory_space<smem>>
    %9 = vector.broadcast %8 : f32 to vector<16x16x8xf32>
    %c0_16 = arith.constant 0 : index
    %c0_17 = arith.constant 0 : index
    %c0_18 = arith.constant 0 : index
    %10 = vector.load %arg4[%c0_16, %c0_17, %c0_18] : memref<18x18x8xf32, #tpu.memory_space<vmem>>, vector<16x16x8xf32>
    %c0_19 = arith.constant 0 : index
    %11 = memref.load %arg1[%c0_19] : memref<10xf32, #tpu.memory_space<smem>>
    %12 = vector.broadcast %11 : f32 to vector<16x16x8xf32>
    %13 = arith.mulf %10, %12 : vector<16x16x8xf32>
    %14 = arith.addf %9, %13 : vector<16x16x8xf32>
    %c0_20 = arith.constant 0 : index
    %c1_21 = arith.constant 1 : index
    %c0_22 = arith.constant 0 : index
    %15 = vector.load %arg4[%c0_20, %c1_21, %c0_22] : memref<18x18x8xf32, #tpu.memory_space<vmem>>, vector<16x16x8xf32>
    %c1_23 = arith.constant 1 : index
    %16 = memref.load %arg1[%c1_23] : memref<10xf32, #tpu.memory_space<smem>>
    %17 = vector.broadcast %16 : f32 to vector<16x16x8xf32>
    %18 = arith.mulf %15, %17 : vector<16x16x8xf32>
    %19 = arith.addf %14, %18 : vector<16x16x8xf32>
    %c0_24 = arith.constant 0 : index
    %c2 = arith.constant 2 : index
    %c0_25 = arith.constant 0 : index
    %20 = vector.load %arg4[%c0_24, %c2, %c0_25] : memref<18x18x8xf32, #tpu.memory_space<vmem>>, vector<16x16x8xf32>
    %c2_26 = arith.constant 2 : index
    %21 = memref.load %arg1[%c2_26] : memref<10xf32, #tpu.memory_space<smem>>
    %22 = vector.broadcast %21 : f32 to vector<16x16x8xf32>
    %23 = arith.mulf %20, %22 : vector<16x16x8xf32>
    %24 = arith.addf %19, %23 : vector<16x16x8xf32>
    %c1_27 = arith.constant 1 : index
    %c0_28 = arith.constant 0 : index
    %c0_29 = arith.constant 0 : index
    %25 = vector.load %arg4[%c1_27, %c0_28, %c0_29] : memref<18x18x8xf32, #tpu.memory_space<vmem>>, vector<16x16x8xf32>
    %c3 = arith.constant 3 : index
    %26 = memref.load %arg1[%c3] : memref<10xf32, #tpu.memory_space<smem>>
    %27 = vector.broadcast %26 : f32 to vector<16x16x8xf32>
    %28 = arith.mulf %25, %27 : vector<16x16x8xf32>
    %29 = arith.addf %24, %28 : vector<16x16x8xf32>
    %c1_30 = arith.constant 1 : index
    %c1_31 = arith.constant 1 : index
    %c0_32 = arith.constant 0 : index
    %30 = vector.load %arg4[%c1_30, %c1_31, %c0_32] : memref<18x18x8xf32, #tpu.memory_space<vmem>>, vector<16x16x8xf32>
    %c4 = arith.constant 4 : index
    %31 = memref.load %arg1[%c4] : memref<10xf32, #tpu.memory_space<smem>>
    %32 = vector.broadcast %31 : f32 to vector<16x16x8xf32>
    %33 = arith.mulf %30, %32 : vector<16x16x8xf32>
    %34 = arith.addf %29, %33 : vector<16x16x8xf32>
    %c1_33 = arith.constant 1 : index
    %c2_34 = arith.constant 2 : index
    %c0_35 = arith.constant 0 : index
    %35 = vector.load %arg4[%c1_33, %c2_34, %c0_35] : memref<18x18x8xf32, #tpu.memory_space<vmem>>, vector<16x16x8xf32>
    %c5 = arith.constant 5 : index
    %36 = memref.load %arg1[%c5] : memref<10xf32, #tpu.memory_space<smem>>
    %37 = vector.broadcast %36 : f32 to vector<16x16x8xf32>
    %38 = arith.mulf %35, %37 : vector<16x16x8xf32>
    %39 = arith.addf %34, %38 : vector<16x16x8xf32>
    %c2_36 = arith.constant 2 : index
    %c0_37 = arith.constant 0 : index
    %c0_38 = arith.constant 0 : index
    %40 = vector.load %arg4[%c2_36, %c0_37, %c0_38] : memref<18x18x8xf32, #tpu.memory_space<vmem>>, vector<16x16x8xf32>
    %c6 = arith.constant 6 : index
    %41 = memref.load %arg1[%c6] : memref<10xf32, #tpu.memory_space<smem>>
    %42 = vector.broadcast %41 : f32 to vector<16x16x8xf32>
    %43 = arith.mulf %40, %42 : vector<16x16x8xf32>
    %44 = arith.addf %39, %43 : vector<16x16x8xf32>
    %c2_39 = arith.constant 2 : index
    %c1_40 = arith.constant 1 : index
    %c0_41 = arith.constant 0 : index
    %45 = vector.load %arg4[%c2_39, %c1_40, %c0_41] : memref<18x18x8xf32, #tpu.memory_space<vmem>>, vector<16x16x8xf32>
    %c7 = arith.constant 7 : index
    %46 = memref.load %arg1[%c7] : memref<10xf32, #tpu.memory_space<smem>>
    %47 = vector.broadcast %46 : f32 to vector<16x16x8xf32>
    %48 = arith.mulf %45, %47 : vector<16x16x8xf32>
    %49 = arith.addf %44, %48 : vector<16x16x8xf32>
    %c2_42 = arith.constant 2 : index
    %c2_43 = arith.constant 2 : index
    %c0_44 = arith.constant 0 : index
    %50 = vector.load %arg4[%c2_42, %c2_43, %c0_44] : memref<18x18x8xf32, #tpu.memory_space<vmem>>, vector<16x16x8xf32>
    %c8 = arith.constant 8 : index
    %51 = memref.load %arg1[%c8] : memref<10xf32, #tpu.memory_space<smem>>
    %52 = vector.broadcast %51 : f32 to vector<16x16x8xf32>
    %53 = arith.mulf %50, %52 : vector<16x16x8xf32>
    %54 = arith.addf %49, %53 : vector<16x16x8xf32>
    %c0_45 = arith.constant 0 : index
    %c0_46 = arith.constant 0 : index
    %c0_47 = arith.constant 0 : index
    %55 = vector.load %arg3[%c0_45, %c0_46, %c0_47] : memref<16x16x8xf32, #tpu.memory_space<vmem>>, vector<16x16x8xf32>
    tpu.vector_store %arg3[%c0_45, %c0_46, %c0_47], %54 {strides = array<i32>} : memref<16x16x8xf32, #tpu.memory_space<vmem>>, vector<16x16x8xf32>,
    return
  }
  func.func @transform_0(%arg0: i32) -> i32 {
    %c0_i32 = arith.constant 0 : i32
    %c0_i32_0 = arith.constant 0 : i32
    return %c0_i32 : i32
  }
  func.func @transform_1(%arg0: i32) -> (i32, i32, i32) {
    %c0_i32 = arith.constant 0 : i32
    %c0_i32_0 = arith.constant 0 : i32
    %c0_i32_1 = arith.constant 0 : i32
    return %c0_i32, %c0_i32_0, %arg0 : i32, i32, i32
  }
  func.func @transform_2(%arg0: i32) -> (i32, i32, i32) {
    %c0_i32 = arith.constant 0 : i32
    %c0_i32_0 = arith.constant 0 : i32
    %c0_i32_1 = arith.constant 0 : i32
    return %c0_i32, %c0_i32_0, %arg0 : i32, i32, i32
  }
}

</mosaic_0001>

<bundles_post_ra>
// kernel: tpu_custom_call.1
= control target key start
LH: loop header
LB: loop body
LE: loop exit
PB: predicated region body
PF: predicated region fallthrough
CT: control target
= control target key end

     0   :  { %7 = vsyncpa [#allocation4], 0  ;;  %s1078_s12 = smov [#allocation3]   ;;  %s1891_s0 = inlined_call_operand.vmem [shape: f32[10], index: 0, kind: input, shape index: {}]   ;;  %s1892_s1 = inlined_call_operand.vmem [shape: f32[16,16,8], index: 1, kind: input, shape index: {}]   ;;  %s1893_s2 = inlined_call_operand.vmem [shape: f32[16,16,8], index: 2, kind: output, shape index: {}]  }
   0x1   :  { %s13_s11 = sshll.u32 %s1891_s0, 4  ;;  %s14_s11 = int_to_ptr.vmem [resolvable:$true] %s13_s11 }
   0x2   :  { %16 = dma.vmem_to_smem %s14_s11, 16, %s1078_s12, [#allocation4]  }
   0x3   :  { %1076 = dma.done.wait [#allocation4], 16  }
   0x4   :  { %1077 = vsyncadd [#allocation4], 4294967280 }
   0x5   :  { %23 = sfence }
   0x6   :  { %vm24_vm0 = vcmask 64512   ;;  %v1079_v0 = vmov 0.0   ;;  %vm27_vm1 = vcmask 58368   ;;  %vm34_vm2 = vcmask 57344   ;;  %s1053_s0 = sld [smem:[#allocation3 + $0x9]]  ;;  %v67_v1 = vld [vmem:[%s1892_s1] sm:$0xff] }
   0x7   :  { %25 = vst.msk [vmem:[#allocation2] sm:$0xff] %vm24_vm0, %v1079_v0  ;;  %s165_s13 = sld [smem:[#allocation3]]  ;;  %v68_v2 = vld [vmem:[%s1892_s1 + $0x8] sm:$0xff]  ;;  %v69_v3 = vld [vmem:[%s1892_s1 + $0x10] sm:$0xff]  ;;  %v70_v9 = vld [vmem:[%s1892_s1 + $0x18] sm:$0xff] }
   0x8   :  { %26 = vst.msk [vmem:[#allocation2 + $0x8] sm:$0xff] %vm24_vm0, %v1079_v0  ;;  %s1054_s14 = sld [smem:[#allocation3 + $0x1]]  ;;  %v71_v12 = vld [vmem:[%s1892_s1 + $0x20] sm:$0xff]  ;;  %v72_v16 = vld [vmem:[%s1892_s1 + $0x28] sm:$0xff]  ;;  %v73_v20 = vld [vmem:[%s1892_s1 + $0x30] sm:$0xff] }
   0x9   :  { %30 = vst.msk [vmem:[#allocation2 + $0x198] sm:$0xff] %vm24_vm0, %v1079_v0  ;;  %s1055_s15 = sld [smem:[#allocation3 + $0x2]]  ;;  %v74_v22 = vld [vmem:[%s1892_s1 + $0x38] sm:$0xff]  ;;  %v75_v27 = vld [vmem:[%s1892_s1 + $0x40] sm:$0xff]  ;;  %v76_v29 = vld [vmem:[%s1892_s1 + $0x48] sm:$0xff] }
   0xa   :  { %31 = vst.msk [vmem:[#allocation2 + $0x1a0] sm:$0xff] %vm24_vm0, %v1079_v0  ;;  %s1135_s18 = sld [smem:[#allocation3 + $0x3]]  ;;  %v77_v33 = vld [vmem:[%s1892_s1 + $0x50] sm:$0xff]  ;;  %v78_v37 = vld [vmem:[%s1892_s1 + $0x58] sm:$0xff]  ;;  %v79_v43 = vld [vmem:[%s1892_s1 + $0x60] sm:$0xff] }
   0xb   :  { %28 = vst.msk [vmem:[#allocation2 + $0x10] sm:$0x3] %vm27_vm1, %v1079_v0  ;;  %s1141_s21 = sld [smem:[#allocation3 + $0x4]]  ;;  %v80_v47 = vld [vmem:[%s1892_s1 + $0x68] sm:$0xff]  ;;  %v81_v52 = vld [vmem:[%s1892_s1 + $0x70] sm:$0xff]  ;;  %v82_v58 = vld [vmem:[%s1892_s1 + $0x78] sm:$0xff] }
   0xc   :  { %32 = vst.msk [vmem:[#allocation2 + $0x1a8] sm:$0x3] %vm27_vm1, %v1079_v0  ;;  %v1147_v4 = vstv %s1053_s0  ;;  %s1158_s26 = sld [smem:[#allocation3 + $0x5]] }
   0xd   :  { %35 = vst.msk [vmem:[#allocation2 + $0x18] sm:$0x1] %vm34_vm2, %v1079_v0  ;;  %v1149_v6 = vstv %s165_s13  ;;  %s1166_s29 = sld [smem:[#allocation3 + $0x6]] }
   0xe   :  { %36 = vst.msk [vmem:[#allocation2 + $0x30] sm:$0x1] %vm34_vm2, %v1079_v0  ;;  %v133_v5 = vld [vmem:[#allocation2] sm:$0xff]  ;;  %v1151_v8 = vstv %s1054_s14  ;;  %s1174_s4 = sld [smem:[#allocation3 + $0x7]] }
   0xf   :  { %37 = vst.msk [vmem:[#allocation2 + $0x48] sm:$0x1] %vm34_vm2, %v1079_v0  ;;  %v231_v7 = vld [vmem:[#allocation2 + $0x1] sm:$0xff]  ;;  %v167_v10 = vmul.f32 %v1149_v6, %v133_v5  ;;  %v1164_v14 = vstv %s1055_s15  ;;  %s1181_s7 = sld [smem:[#allocation3 + $0x8]] }
  0x10   :  { %38 = vst.msk [vmem:[#allocation2 + $0x60] sm:$0x1] %vm34_vm2, %v1079_v0  ;;  %v134_v11 = vld [vmem:[#allocation2 + $0x8] sm:$0xff]  ;;  %v265_v18 = vmul.f32 %v1151_v8, %v231_v7  ;;  %v1195_v28 = vstv %s1135_s18 }
  0x11   :  { %39 = vst.msk [vmem:[#allocation2 + $0x78] sm:$0x1] %vm34_vm2, %v1079_v0  ;;  %v329_v13 = vld [vmem:[#allocation2 + $0x2] sm:$0xff]  ;;  %v199_v17 = vadd.f32 %v167_v10, %v1147_v4  ;;  %v168_v19 = vmul.f32 %v1149_v6, %v134_v11  ;;  %v1207_v36 = vstv %s1141_s21 }
  0x12   :  { %40 = vst.msk [vmem:[#allocation2 + $0x90] sm:$0x1] %vm34_vm2, %v1079_v0  ;;  %v232_v15 = vld [vmem:[#allocation2 + $0x9] sm:$0xff]  ;;  %v363_v24 = vmul.f32 %v1164_v14, %v329_v13  ;;  %v1220_v45 = vstv %s1158_s26 }
  0x13   :  { %41 = vst.msk [vmem:[#allocation2 + $0xa8] sm:$0x1] %vm34_vm2, %v1079_v0  ;;  %v330_v21 = vld [vmem:[#allocation2 + $0xa] sm:$0xff]  ;;  %v297_v23 = vadd.f32 %v265_v18, %v199_v17  ;;  %v200_v25 = vadd.f32 %v168_v19, %v1147_v4  ;;  %v266_v26 = vmul.f32 %v1151_v8, %v232_v15  ;;  %v1229_v50 = vstv %s1166_s29 }
  0x14   :  { %42 = vst.msk [vmem:[#allocation2 + $0xc0] sm:$0x1] %vm34_vm2, %v1079_v0  ;;  %v364_v32 = vmul.f32 %v1164_v14, %v330_v21  ;;  %v1236_v54 = vstv %s1174_s4  ;;  %v86_v21 = vld [vmem:[%s1892_s1 + $0x98] sm:$0xff] }
  0x15   :  { %43 = vst.msk [vmem:[#allocation2 + $0xd8] sm:$0x1] %vm34_vm2, %v1079_v0  ;;  %v395_v30 = vadd.f32 %v363_v24, %v297_v23  ;;  %v298_v31 = vadd.f32 %v266_v26, %v200_v25  ;;  %v1239_v55 = vstv %s1181_s7 }
  0x16   :  { %44 = vst.msk [vmem:[#allocation2 + $0xf0] sm:$0x1] %vm34_vm2, %v1079_v0 }
  0x17   :  { %45 = vst.msk [vmem:[#allocation2 + $0x108] sm:$0x1] %vm34_vm2, %v1079_v0  ;;  %v396_v39 = vadd.f32 %v364_v32, %v298_v31 }
  0x18   :  { %46 = vst.msk [vmem:[#allocation2 + $0x120] sm:$0x1] %vm34_vm2, %v1079_v0 }
  0x19   :  { %47 = vst.msk [vmem:[#allocation2 + $0x138] sm:$0x1] %vm34_vm2, %v1079_v0 }
  0x1a   :  { %48 = vst.msk [vmem:[#allocation2 + $0x150] sm:$0x1] %vm34_vm2, %v1079_v0 }
  0x1b   :  { %49 = vst.msk [vmem:[#allocation2 + $0x168] sm:$0x1] %vm34_vm2, %v1079_v0 }
  0x1c   :  { %50 = vst.msk [vmem:[#allocation2 + $0x180] sm:$0x1] %vm34_vm2, %v1079_v0 }
  0x1d   :  { %51 = vst.msk [vmem:[#allocation2 + $0x29] sm:$0x1] %vm34_vm2, %v1079_v0 }
  0x1e   :  { %52 = vst.msk [vmem:[#allocation2 + $0x41] sm:$0x1] %vm34_vm2, %v1079_v0 }
  0x1f   :  { %53 = vst.msk [vmem:[#allocation2 + $0x59] sm:$0x1] %vm34_vm2, %v1079_v0 }
  0x20   :  { %54 = vst.msk [vmem:[#allocation2 + $0x71] sm:$0x1] %vm34_vm2, %v1079_v0 }
  0x21   :  { %55 = vst.msk [vmem:[#allocation2 + $0x89] sm:$0x1] %vm34_vm2, %v1079_v0 }
  0x22   :  { %56 = vst.msk [vmem:[#allocation2 + $0xa1] sm:$0x1] %vm34_vm2, %v1079_v0 }
  0x23   :  { %57 = vst.msk [vmem:[#allocation2 + $0xb9] sm:$0x1] %vm34_vm2, %v1079_v0 }
  0x24   :  { %58 = vst.msk [vmem:[#allocation2 + $0xd1] sm:$0x1] %vm34_vm2, %v1079_v0 }
  0x25   :  { %59 = vst.msk [vmem:[#allocation2 + $0xe9] sm:$0x1] %vm34_vm2, %v1079_v0 }
  0x26   :  { %60 = vst.msk [vmem:[#allocation2 + $0x101] sm:$0x1] %vm34_vm2, %v1079_v0 }
  0x27   :  { %61 = vst.msk [vmem:[#allocation2 + $0x119] sm:$0x1] %vm34_vm2, %v1079_v0 }
  0x28   :  { %62 = vst.msk [vmem:[#allocation2 + $0x131] sm:$0x1] %vm34_vm2, %v1079_v0 }
  0x29   :  { %63 = vst.msk [vmem:[#allocation2 + $0x149] sm:$0x1] %vm34_vm2, %v1079_v0 }
  0x2a   :  { %64 = vst.msk [vmem:[#allocation2 + $0x161] sm:$0x1] %vm34_vm2, %v1079_v0 }
  0x2b   :  { %65 = vst.msk [vmem:[#allocation2 + $0x179] sm:$0x1] %vm34_vm2, %v1079_v0 }
  0x2c   :  { %66 = vst.msk [vmem:[#allocation2 + $0x191] sm:$0x1] %vm34_vm2, %v1079_v0 }
  0x2d   :  { %99 = vst.msk [vmem:[#allocation2 + $0x19] sm:$0xff] %vm24_vm0, %v67_v1  ;;  %v83_v1 = vld [vmem:[%s1892_s1 + $0x80] sm:$0xff] }
  0x2e   :  { %100 = vst.msk [vmem:[#allocation2 + $0x21] sm:$0xff] %vm24_vm0, %v68_v2 }
  0x2f   :  { %101 = vst.msk [vmem:[#allocation2 + $0x31] sm:$0xff] %vm24_vm0, %v69_v3 }
  0x30   :  { %102 = vst.msk [vmem:[#allocation2 + $0x39] sm:$0xff] %vm24_vm0, %v70_v9  ;;  %v84_v9 = vld [vmem:[%s1892_s1 + $0x88] sm:$0xff] }
  0x31   :  { %103 = vst.msk [vmem:[#allocation2 + $0x49] sm:$0xff] %vm24_vm0, %v71_v12 }
  0x32   :  { %104 = vst.msk [vmem:[#allocation2 + $0x51] sm:$0xff] %vm24_vm0, %v72_v16  ;;  %v85_v16 = vld [vmem:[%s1892_s1 + $0x90] sm:$0xff] }
  0x33   :  { %105 = vst.msk [vmem:[#allocation2 + $0x61] sm:$0xff] %vm24_vm0, %v73_v20 }
  0x34   :  { %106 = vst.msk [vmem:[#allocation2 + $0x69] sm:$0xff] %vm24_vm0, %v74_v22  ;;  %v427_v34 = vld [vmem:[#allocation2 + $0x18] sm:$0xff] }
  0x35   :  { %v525_v35 = vld [vmem:[#allocation2 + $0x19] sm:$0xff]  ;;  %107 = vst.msk [vmem:[#allocation2 + $0x79] sm:$0xff] %vm24_vm0, %v75_v27  ;;  %v461_v38 = vmul.f32 %v1195_v28, %v427_v34  ;;  %v526_v41 = vld [vmem:[#allocation2 + $0x21] sm:$0xff]  ;;  %v169_v42 = vmul.f32 %v427_v34, %v1149_v6 }
  0x36   :  { %v428_v40 = vld [vmem:[#allocation2 + $0x20] sm:$0xff]  ;;  %108 = vst.msk [vmem:[#allocation2 + $0x81] sm:$0xff] %vm24_vm0, %v76_v29  ;;  %v559_v49 = vmul.f32 %v1207_v36, %v525_v35  ;;  %v722_v53 = vld [vmem:[#allocation2 + $0x30] sm:$0xff]  ;;  %v560_v57 = vmul.f32 %v1207_v36, %v526_v41  ;;  %v267_v0 = vmul.f32 %v525_v35, %v1151_v8  ;;  %v268_v34 = vmul.f32 %v526_v41, %v1151_v8  ;;  %v88_v35 = vld [vmem:[%s1892_s1 + $0xa8] sm:$0xff] }
  0x37   :  { %v623_v44 = vld [vmem:[#allocation2 + $0x1a] sm:$0xff]  ;;  %v462_v46 = vmul.f32 %v1195_v28, %v428_v40  ;;  %109 = vst.msk [vmem:[#allocation2 + $0x91] sm:$0xff] %vm24_vm0, %v77_v33  ;;  %v493_v48 = vadd.f32 %v461_v38, %v395_v30  ;;  %v624_v51 = vld [vmem:[#allocation2 + $0x22] sm:$0xff]  ;;  %v1247_v61 = vld [vmem:[#allocation2 + $0x31] sm:$0xff]  ;;  %v201_v63 = vadd.f32 %v169_v42, %v1147_v4  ;;  %v756_v11 = vmul.f32 %v1229_v50, %v722_v53 }
  0x38   :  { %110 = vst.msk [vmem:[#allocation2 + $0x99] sm:$0xff] %vm24_vm0, %v78_v37  ;;  %v657_v60 = vmul.f32 %v1220_v45, %v623_v44  ;;  %v1249_v62 = vld [vmem:[#allocation2 + $0x32] sm:$0xff]  ;;  %v658_v3 = vmul.f32 %v1220_v45, %v624_v51  ;;  %v1267_v12 = vld [vmem:[#allocation2 + $0x3a] sm:$0xff]  ;;  %v365_v15 = vmul.f32 %v623_v44, %v1164_v14  ;;  %v854_v17 = vmul.f32 %v1236_v54, %v1247_v61  ;;  %v1290_v26 = vld [vmem:[#allocation2 + $0x48] sm:$0xff] }
  0x39   :  { %v494_v56 = vadd.f32 %v462_v46, %v396_v39  ;;  %111 = vst.msk [vmem:[#allocation2 + $0xa9] sm:$0xff] %vm24_vm0, %v79_v43  ;;  %v591_v59 = vadd.f32 %v559_v49, %v493_v48  ;;  %v1258_v5 = vld [vmem:[#allocation2 + $0x38] sm:$0xff]  ;;  %v299_v13 = vadd.f32 %v267_v0, %v201_v63  ;;  %v1278_v18 = vmul.f32 %v1239_v55, %v1249_v62  ;;  %v87_v27 = vld [vmem:[%s1892_s1 + $0xa0] sm:$0xff]  ;;  %v1298_v31 = vld [vmem:[#allocation2 + $0x49] sm:$0xff] }
  0x3a   :  { %112 = vst.msk [vmem:[#allocation2 + $0xb1] sm:$0xff] %vm24_vm0, %v80_v47  ;;  %v1260_v7 = vld [vmem:[#allocation2 + $0x39] sm:$0xff]  ;;  %v170_v20 = vmul.f32 %v428_v40, %v1149_v6  ;;  %v757_v22 = vmul.f32 %v1229_v50, %v1258_v5  ;;  %v463_v25 = vmul.f32 %v722_v53, %v1195_v28  ;;  %v953_v30 = vmul.f32 %v1239_v55, %v1267_v12  ;;  %v1300_v32 = vld [vmem:[#allocation2 + $0x4a] sm:$0xff] }
  0x3b   :  { %v592_v2 = vadd.f32 %v560_v57, %v494_v56  ;;  %113 = vst.msk [vmem:[#allocation2 + $0xc1] sm:$0xff] %vm24_vm0, %v81_v52  ;;  %v689_v10 = vadd.f32 %v657_v60, %v591_v59  ;;  %v855_v23 = vmul.f32 %v1236_v54, %v1260_v7  ;;  %v397_v24 = vadd.f32 %v365_v15, %v299_v13  ;;  %v89_v41 = vld [vmem:[%s1892_s1 + $0xb0] sm:$0xff]  ;;  %v90_v47 = vld [vmem:[%s1892_s1 + $0xb8] sm:$0xff] }
  0x3c   :  { %114 = vst.msk [vmem:[#allocation2 + $0xc9] sm:$0xff] %vm24_vm0, %v82_v58  ;;  %v202_v33 = vadd.f32 %v170_v20, %v1147_v4  ;;  %v561_v39 = vmul.f32 %v1247_v61, %v1207_v36  ;;  %v659_v40 = vmul.f32 %v1249_v62, %v1220_v45  ;;  %v758_v42 = vmul.f32 %v1229_v50, %v1290_v26  ;;  %v1330_v57 = vld [vmem:[#allocation2 + $0x50] sm:$0xff] }
  0x3d   :  { %v690_v19 = vadd.f32 %v658_v3, %v592_v2  ;;  %115 = vst.msk [vmem:[#allocation2 + $0xd9] sm:$0xff] %vm24_vm0, %v83_v1  ;;  %v788_v29 = vadd.f32 %v756_v11, %v689_v10  ;;  %v495_v38 = vadd.f32 %v463_v25, %v397_v24  ;;  %v366_v44 = vmul.f32 %v624_v51, %v1164_v14  ;;  %v91_v51 = vld [vmem:[%s1892_s1 + $0xc0] sm:$0xff]  ;;  %v1336_v59 = vld [vmem:[#allocation2 + $0x51] sm:$0xff]  ;;  %v92_v1 = vld [vmem:[%s1892_s1 + $0xc8] sm:$0xff] }
  0x3e   :  { %116 = vst.msk [vmem:[#allocation2 + $0xe1] sm:$0xff] %vm24_vm0, %v84_v9  ;;  %v300_v43 = vadd.f32 %v268_v34, %v202_v33  ;;  %v171_v46 = vmul.f32 %v722_v53, %v1149_v6  ;;  %v856_v49 = vmul.f32 %v1236_v54, %v1298_v31  ;;  %v954_v52 = vmul.f32 %v1239_v55, %v1300_v32  ;;  %v1338_v60 = vld [vmem:[#allocation2 + $0x52] sm:$0xff] }
  0x3f   :  { %117 = vst.msk [vmem:[#allocation2 + $0xf1] sm:$0xff] %vm24_vm0, %v85_v16  ;;  %v789_v37 = vadd.f32 %v757_v22, %v690_v19  ;;  %v593_v48 = vadd.f32 %v561_v39, %v495_v38  ;;  %v464_v56 = vmul.f32 %v1258_v5, %v1195_v28  ;;  %v886_v53 = vadd.f32 %v854_v17, %v788_v29  ;;  %v94_v17 = vld [vmem:[%s1892_s1 + $0xd8] sm:$0xff]  ;;  %v1376_v29 = vld [vmem:[#allocation2 + $0x60] sm:$0xff]  ;;  %v97_v38 = vld [vmem:[%s1892_s1 + $0xf0] sm:$0xff] }
  0x40   :  { %118 = vst.msk [vmem:[#allocation2 + $0xf9] sm:$0xff] %vm24_vm0, %v86_v21  ;;  %v398_v58 = vadd.f32 %v366_v44, %v300_v43  ;;  %v203_v63 = vadd.f32 %v171_v46, %v1147_v4  ;;  %v269_v0 = vmul.f32 %v1247_v61, %v1151_v8  ;;  %v562_v9 = vmul.f32 %v1260_v7, %v1207_v36  ;;  %v93_v61 = vld [vmem:[%s1892_s1 + $0xd0] sm:$0xff]  ;;  %v1401_v43 = vld [vmem:[#allocation2 + $0x62] sm:$0xff] }
  0x41   :  { %119 = vst.msk [vmem:[#allocation2 + $0x109] sm:$0xff] %vm24_vm0, %v87_v27  ;;  %v887_v2 = vadd.f32 %v855_v23, %v789_v37  ;;  %v691_v3 = vadd.f32 %v659_v40, %v593_v48  ;;  %v660_v10 = vmul.f32 %v1267_v12, %v1220_v45  ;;  %v759_v13 = vmul.f32 %v1229_v50, %v1330_v57 }
  0x42   :  { %120 = vst.msk [vmem:[#allocation2 + $0x111] sm:$0xff] %vm24_vm0, %v88_v35  ;;  %v496_v11 = vadd.f32 %v464_v56, %v398_v58  ;;  %v301_v15 = vadd.f32 %v269_v0, %v203_v63  ;;  %v367_v16 = vmul.f32 %v1249_v62, %v1164_v14  ;;  %v857_v20 = vmul.f32 %v1236_v54, %v1336_v59  ;;  %v95_v62 = vld [vmem:[%s1892_s1 + $0xe0] sm:$0xff] }
  0x43   :  { %121 = vst.msk [vmem:[#allocation2 + $0x121] sm:$0xff] %vm24_vm0, %v89_v41  ;;  %v790_v19 = vadd.f32 %v758_v42, %v691_v3  ;;  %v955_v21 = vmul.f32 %v1239_v55, %v1338_v60  ;;  %v172_v22 = vmul.f32 %v1258_v5, %v1149_v6  ;;  %v984_v23 = vadd.f32 %v1278_v18, %v886_v53  ;;  %v96_v5 = vld [vmem:[%s1892_s1 + $0xe8] sm:$0xff] }
  0x44   :  { %122 = vst.msk [vmem:[#allocation2 + $0x129] sm:$0xff] %vm24_vm0, %v90_v47  ;;  %v594_v24 = vadd.f32 %v562_v9, %v496_v11  ;;  %v399_v25 = vadd.f32 %v367_v16, %v301_v15  ;;  %v465_v27 = vmul.f32 %v1290_v26, %v1195_v28  ;;  %v985_v33 = vadd.f32 %v953_v30, %v887_v2  ;;  %v1382_v35 = vld [vmem:[#allocation2 + $0x61] sm:$0xff]  ;;  %v825_v9 = vld [vmem:[#allocation2 + $0x69] sm:$0xff] }
  0x45   :  { %123 = vst.msk [vmem:[#allocation2 + $0x139] sm:$0xff] %vm24_vm0, %v91_v51  ;;  %v888_v34 = vadd.f32 %v856_v49, %v790_v19  ;;  %v204_v37 = vadd.f32 %v172_v22, %v1147_v4  ;;  %v270_v18 = vmul.f32 %v1260_v7, %v1151_v8  ;;  %v563_v41 = vmul.f32 %v1298_v31, %v1207_v36  ;;  %v98_v7 = vld [vmem:[%s1892_s1 + $0xf8] sm:$0xff]  ;;  %v727_v3 = vld [vmem:[#allocation2 + $0x68] sm:$0xff] }
  0x46   :  { %124 = vst.msk [vmem:[#allocation2 + $0x141] sm:$0xff] %vm24_vm0, %v92_v1  ;;  %v692_v39 = vadd.f32 %v660_v10, %v594_v24  ;;  %v497_v40 = vadd.f32 %v465_v27, %v399_v25  ;;  %v661_v30 = vmul.f32 %v1300_v32, %v1220_v45  ;;  %v760_v42 = vmul.f32 %v1229_v50, %v1376_v29  ;;  %v728_v27 = vld [vmem:[#allocation2 + $0x78] sm:$0xff] }
  0x47   :  { %125 = vst.msk [vmem:[#allocation2 + $0x151] sm:$0xff] %vm24_vm0, %v93_v61  ;;  %v302_v44 = vadd.f32 %v270_v18, %v204_v37  ;;  %v368_v46 = vmul.f32 %v1267_v12, %v1164_v14  ;;  %v173_v47 = vmul.f32 %v1290_v26, %v1149_v6  ;;  %v858_v56 = vmul.f32 %v1236_v54, %v1382_v35 }
  0x48   :  { %126 = vst.msk [vmem:[#allocation2 + $0x159] sm:$0xff] %vm24_vm0, %v94_v17  ;;  %v791_v48 = vadd.f32 %v759_v13, %v692_v39  ;;  %v595_v49 = vadd.f32 %v563_v41, %v497_v40  ;;  %v466_v51 = vmul.f32 %v1330_v57, %v1195_v28  ;;  %v986_v53 = vadd.f32 %v954_v52, %v888_v34  ;;  %v924_v41 = vld [vmem:[#allocation2 + $0x7a] sm:$0xff] }
  0x49   :  { %127 = vst.msk [vmem:[#allocation2 + $0x169] sm:$0xff] %vm24_vm0, %v95_v62  ;;  %v400_v58 = vadd.f32 %v368_v46, %v302_v44  ;;  %v205_v63 = vadd.f32 %v173_v47, %v1147_v4  ;;  %v271_v12 = vmul.f32 %v1298_v31, %v1151_v8  ;;  %v956_v1 = vmul.f32 %v1239_v55, %v1401_v43 }
  0x4a   :  { %128 = vst.msk [vmem:[#allocation2 + $0x171] sm:$0xff] %vm24_vm0, %v96_v5  ;;  %v889_v26 = vadd.f32 %v857_v20, %v791_v48  ;;  %v693_v0 = vadd.f32 %v661_v30, %v595_v49  ;;  %v564_v2 = vmul.f32 %v1336_v59, %v1207_v36  ;;  %v369_v31 = vmul.f32 %v1300_v32, %v1164_v14  ;;  %v826_v5 = vld [vmem:[#allocation2 + $0x79] sm:$0xff] }
  0x4b   :  { %129 = vst.msk [vmem:[#allocation2 + $0x181] sm:$0xff] %vm24_vm0, %v97_v38  ;;  %v498_v52 = vadd.f32 %v466_v51, %v400_v58  ;;  %v303_v10 = vadd.f32 %v271_v12, %v205_v63  ;;  %v174_v61 = vmul.f32 %v1330_v57, %v1149_v6  ;;  %v662_v15 = vmul.f32 %v1338_v60, %v1220_v45  ;;  %v923_v57 = vld [vmem:[#allocation2 + $0x6a] sm:$0xff]  ;;  %v729_v51 = vld [vmem:[#allocation2 + $0x80] sm:$0xff] }
  0x4c   :  { %130 = vst.msk [vmem:[#allocation2 + $0x189] sm:$0xff] %vm24_vm0, %v98_v7  ;;  %v987_v11 = vadd.f32 %v955_v21, %v889_v26  ;;  %v792_v13 = vadd.f32 %v760_v42, %v693_v0  ;;  %v467_v16 = vmul.f32 %v1376_v29, %v1195_v28  ;;  %v272_v20 = vmul.f32 %v1336_v59, %v1151_v8 }
  0x4d   :  { %1016 = vst.msk [vmem:[%s1893_s2] sm:$0xff] %vm24_vm0, %v984_v23  ;;  %v596_v32 = vadd.f32 %v564_v2, %v498_v52  ;;  %v401_v17 = vadd.f32 %v369_v31, %v303_v10  ;;  %v206_v19 = vadd.f32 %v174_v61, %v1147_v4  ;;  %v761_v22 = vmul.f32 %v1229_v50, %v727_v3  ;;  %v925_v2 = vld [vmem:[#allocation2 + $0x82] sm:$0xff] }
  0x4e   :  { %1017 = vst.msk [vmem:[%s1893_s2 + $0x8] sm:$0xff] %vm24_vm0, %v985_v33  ;;  %v890_v21 = vadd.f32 %v858_v56, %v792_v13  ;;  %v859_v62 = vmul.f32 %v1236_v54, %v825_v9  ;;  %v565_v23 = vmul.f32 %v1382_v35, %v1207_v36  ;;  %v370_v59 = vmul.f32 %v1338_v60, %v1164_v14 }
  0x4f   :  { %1018 = vst.msk [vmem:[%s1893_s2 + $0x10] sm:$0xff] %vm24_vm0, %v986_v53  ;;  %v694_v24 = vadd.f32 %v662_v15, %v596_v32  ;;  %v499_v25 = vadd.f32 %v467_v16, %v401_v17  ;;  %v304_v33 = vadd.f32 %v272_v20, %v206_v19  ;;  %v957_v37 = vmul.f32 %v1239_v55, %v923_v57  ;;  %v827_v53 = vld [vmem:[#allocation2 + $0x81] sm:$0xff]  ;;  %v730_v32 = vld [vmem:[#allocation2 + $0x90] sm:$0xff] }
  0x50   :  { %1019 = vst.msk [vmem:[%s1893_s2 + $0x18] sm:$0xff] %vm24_vm0, %v987_v11  ;;  %v988_v34 = vadd.f32 %v956_v1, %v890_v21  ;;  %v663_v18 = vmul.f32 %v1401_v43, %v1220_v45  ;;  %v175_v38 = vmul.f32 %v1376_v29, %v1149_v6  ;;  %v468_v7 = vmul.f32 %v727_v3, %v1195_v28 }
  0x51   :  { %v793_v39 = vadd.f32 %v761_v22, %v694_v24  ;;  %v597_v40 = vadd.f32 %v565_v23, %v499_v25  ;;  %v402_v30 = vadd.f32 %v370_v59, %v304_v33  ;;  %v762_v60 = vmul.f32 %v1229_v50, %v728_v27  ;;  %v828_v22 = vld [vmem:[#allocation2 + $0x91] sm:$0xff] }
  0x52   :  { %1020 = vst.msk [vmem:[%s1893_s2 + $0x20] sm:$0xff] %vm24_vm0, %v988_v34  ;;  %v860_v42 = vmul.f32 %v1236_v54, %v826_v5  ;;  %v207_v44 = vadd.f32 %v175_v38, %v1147_v4  ;;  %v273_v29 = vmul.f32 %v1382_v35, %v1151_v8  ;;  %v566_v49 = vmul.f32 %v825_v9, %v1207_v36  ;;  %v926_v25 = vld [vmem:[#allocation2 + $0x92] sm:$0xff] }
  0x53   :  { %v891_v46 = vadd.f32 %v859_v62, %v793_v39  ;;  %v695_v47 = vadd.f32 %v663_v18, %v597_v40  ;;  %v500_v48 = vadd.f32 %v468_v7, %v402_v30  ;;  %v958_v56 = vmul.f32 %v1239_v55, %v924_v41  ;;  %v731_v30 = vld [vmem:[#allocation2 + $0x98] sm:$0xff] }
  0x54   :  { %v305_v58 = vadd.f32 %v273_v29, %v207_v44  ;;  %v371_v63 = vmul.f32 %v1401_v43, %v1164_v14  ;;  %v176_v12 = vmul.f32 %v727_v3, %v1149_v6  ;;  %v664_v35 = vmul.f32 %v923_v57, %v1220_v45  ;;  %v1499_v7 = vld [vmem:[#allocation2 + $0x99] sm:$0xff] }
  0x55   :  { %v989_v26 = vadd.f32 %v957_v37, %v891_v46  ;;  %v794_v0 = vadd.f32 %v762_v60, %v695_v47  ;;  %v598_v1 = vadd.f32 %v566_v49, %v500_v48  ;;  %v469_v10 = vmul.f32 %v728_v27, %v1195_v28 }
  0x56   :  { %v403_v52 = vadd.f32 %v371_v63, %v305_v58  ;;  %v208_v31 = vadd.f32 %v176_v12, %v1147_v4  ;;  %v274_v61 = vmul.f32 %v825_v9, %v1151_v8  ;;  %v763_v11 = vmul.f32 %v1229_v50, %v729_v51 }
  0x57   :  { %1021 = vst.msk [vmem:[%s1893_s2 + $0x28] sm:$0xff] %vm24_vm0, %v989_v26  ;;  %v892_v43 = vadd.f32 %v860_v42, %v794_v0  ;;  %v696_v3 = vadd.f32 %v664_v35, %v598_v1  ;;  %v861_v13 = vmul.f32 %v1236_v54, %v827_v53  ;;  %v567_v16 = vmul.f32 %v826_v5, %v1207_v36  ;;  %v732_v0 = vld [vmem:[#allocation2 + $0xa8] sm:$0xff] }
  0x58   :  { %v501_v15 = vadd.f32 %v469_v10, %v403_v52  ;;  %v306_v17 = vadd.f32 %v274_v61, %v208_v31  ;;  %v372_v19 = vmul.f32 %v923_v57, %v1164_v14  ;;  %v959_v21 = vmul.f32 %v1239_v55, %v925_v2 }
  0x59   :  { %v990_v20 = vadd.f32 %v958_v56, %v892_v43  ;;  %v795_v9 = vadd.f32 %v763_v11, %v696_v3  ;;  %v177_v62 = vmul.f32 %v728_v27, %v1149_v6  ;;  %v665_v24 = vmul.f32 %v924_v41, %v1220_v45  ;;  %v830_v3 = vld [vmem:[#allocation2 + $0xa9] sm:$0xff] }
  0x5a   :  { %v599_v23 = vadd.f32 %v567_v16, %v501_v15  ;;  %v404_v33 = vadd.f32 %v372_v19, %v306_v17  ;;  %v470_v59 = vmul.f32 %v729_v51, %v1195_v28  ;;  %v764_v34 = vmul.f32 %v1229_v50, %v730_v32  ;;  %v1521_v11 = vld [vmem:[#allocation2 + $0xaa] sm:$0xff] }
  0x5b   :  { %1022 = vst.msk [vmem:[%s1893_s2 + $0x30] sm:$0xff] %vm24_vm0, %v990_v20  ;;  %v893_v57 = vadd.f32 %v861_v13, %v795_v9  ;;  %v209_v37 = vadd.f32 %v177_v62, %v1147_v4  ;;  %v275_v18 = vmul.f32 %v826_v5, %v1151_v8  ;;  %v862_v38 = vmul.f32 %v1236_v54, %v828_v22  ;;  %v1504_v5 = vld [vmem:[#allocation2 + $0x9a] sm:$0xff]  ;;  %v733_v9 = vld [vmem:[#allocation2 + $0xb0] sm:$0xff] }
  0x5c   :  { %v697_v27 = vadd.f32 %v665_v24, %v599_v23  ;;  %v502_v39 = vadd.f32 %v470_v59, %v404_v33  ;;  %v568_v40 = vmul.f32 %v827_v53, %v1207_v36  ;;  %v960_v42 = vmul.f32 %v1239_v55, %v926_v25  ;;  %v831_v59 = vld [vmem:[#allocation2 + $0xb1] sm:$0xff] }
  0x5d   :  { %v991_v60 = vadd.f32 %v959_v21, %v893_v57  ;;  %v307_v44 = vadd.f32 %v275_v18, %v209_v37  ;;  %v373_v29 = vmul.f32 %v924_v41, %v1164_v14  ;;  %v666_v48 = vmul.f32 %v925_v2, %v1220_v45  ;;  %v1538_v37 = vld [vmem:[#allocation2 + $0xb2] sm:$0xff] }
  0x5e   :  { %v796_v46 = vadd.f32 %v764_v34, %v697_v27  ;;  %v600_v47 = vadd.f32 %v568_v40, %v502_v39  ;;  %v178_v49 = vmul.f32 %v729_v51, %v1149_v6  ;;  %v765_v56 = vmul.f32 %v1229_v50, %v731_v30 }
  0x5f   :  { %1023 = vst.msk [vmem:[%s1893_s2 + $0x38] sm:$0xff] %vm24_vm0, %v991_v60  ;;  %v863_v58 = vmul.f32 %v1236_v54, %v1499_v7  ;;  %v405_v63 = vadd.f32 %v373_v29, %v307_v44  ;;  %v471_v41 = vmul.f32 %v730_v32, %v1195_v28  ;;  %v276_v51 = vmul.f32 %v827_v53, %v1151_v8 }
  0x60   :  { %v894_v12 = vadd.f32 %v862_v38, %v796_v46  ;;  %v698_v26 = vadd.f32 %v666_v48, %v600_v47  ;;  %v210_v1 = vadd.f32 %v178_v49, %v1147_v4  ;;  %v961_v35 = vmul.f32 %v1239_v55, %v1504_v5  ;;  %v734_v47 = vld [vmem:[#allocation2 + $0xc0] sm:$0xff] }
  0x61   :  { %v503_v52 = vadd.f32 %v471_v41, %v405_v63  ;;  %v569_v10 = vmul.f32 %v828_v22, %v1207_v36  ;;  %v374_v31 = vmul.f32 %v925_v2, %v1164_v14  ;;  %v179_v15 = vmul.f32 %v730_v32, %v1149_v6  ;;  %v1553_v48 = vld [vmem:[#allocation2 + $0xc1] sm:$0xff] }
  0x62   :  { %v992_v61 = vadd.f32 %v960_v42, %v894_v12  ;;  %v797_v43 = vadd.f32 %v765_v56, %v698_v26  ;;  %v308_v13 = vadd.f32 %v276_v51, %v210_v1  ;;  %v667_v17 = vmul.f32 %v926_v25, %v1220_v45  ;;  %v1561_v26 = vld [vmem:[#allocation2 + $0xc2] sm:$0xff] }
  0x63   :  { %v601_v16 = vadd.f32 %v569_v10, %v503_v52  ;;  %v766_v53 = vmul.f32 %v1229_v50, %v732_v0  ;;  %v472_v19 = vmul.f32 %v731_v30, %v1195_v28  ;;  %v211_v21 = vadd.f32 %v179_v15, %v1147_v4 }
  0x64   :  { %1024 = vst.msk [vmem:[%s1893_s2 + $0x40] sm:$0xff] %vm24_vm0, %v992_v61  ;;  %v895_v2 = vadd.f32 %v863_v58, %v797_v43  ;;  %v406_v20 = vadd.f32 %v374_v31, %v308_v13  ;;  %v277_v62 = vmul.f32 %v828_v22, %v1151_v8  ;;  %v864_v23 = vmul.f32 %v1236_v54, %v830_v3 }
  0x65   :  { %v699_v32 = vadd.f32 %v667_v17, %v601_v16  ;;  %v962_v24 = vmul.f32 %v1239_v55, %v1521_v11  ;;  %v570_v33 = vmul.f32 %v1499_v7, %v1207_v36  ;;  %v375_v27 = vmul.f32 %v926_v25, %v1164_v14 }
  0x66   :  { %v993_v57 = vadd.f32 %v961_v35, %v895_v2  ;;  %v504_v34 = vadd.f32 %v472_v19, %v406_v20  ;;  %v309_v18 = vadd.f32 %v277_v62, %v211_v21  ;;  %v668_v22 = vmul.f32 %v1504_v5, %v1220_v45  ;;  %v735_v19 = vld [vmem:[#allocation2 + $0xc8] sm:$0xff] }
  0x67   :  { %v798_v38 = vadd.f32 %v766_v53, %v699_v32  ;;  %v767_v39 = vmul.f32 %v1229_v50, %v733_v9  ;;  %v180_v40 = vmul.f32 %v731_v30, %v1149_v6  ;;  %v865_v42 = vmul.f32 %v1236_v54, %v831_v59  ;;  %v833_v2 = vld [vmem:[#allocation2 + $0xc9] sm:$0xff] }
  0x68   :  { %1025 = vst.msk [vmem:[%s1893_s2 + $0x48] sm:$0xff] %vm24_vm0, %v993_v57  ;;  %v602_v60 = vadd.f32 %v570_v33, %v504_v34  ;;  %v407_v44 = vadd.f32 %v375_v27, %v309_v18  ;;  %v473_v29 = vmul.f32 %v732_v0, %v1195_v28  ;;  %v963_v46 = vmul.f32 %v1239_v55, %v1538_v37  ;;  %v931_v57 = vld [vmem:[#allocation2 + $0xca] sm:$0xff] }
  0x69   :  { %v896_v25 = vadd.f32 %v864_v23, %v798_v38  ;;  %v212_v30 = vadd.f32 %v180_v40, %v1147_v4  ;;  %v278_v49 = vmul.f32 %v1499_v7, %v1151_v8  ;;  %v571_v63 = vmul.f32 %v830_v3, %v1207_v36 }
  0x6a   :  { %v700_v56 = vadd.f32 %v668_v22, %v602_v60  ;;  %v505_v58 = vadd.f32 %v473_v29, %v407_v44  ;;  %v669_v41 = vmul.f32 %v1521_v11, %v1220_v45  ;;  %v376_v51 = vmul.f32 %v1504_v5, %v1164_v14  ;;  %v736_v60 = vld [vmem:[#allocation2 + $0xd8] sm:$0xff] }
  0x6b   :  { %v994_v12 = vadd.f32 %v962_v24, %v896_v25  ;;  %v310_v1 = vadd.f32 %v278_v49, %v212_v30  ;;  %v181_v35 = vmul.f32 %v732_v0, %v1149_v6  ;;  %v768_v7 = vmul.f32 %v1229_v50, %v734_v47 }
  0x6c   :  { %v799_v52 = vadd.f32 %v767_v39, %v700_v56  ;;  %v603_v10 = vadd.f32 %v571_v63, %v505_v58  ;;  %v866_v31 = vmul.f32 %v1236_v54, %v1553_v48  ;;  %v474_v43 = vmul.f32 %v733_v9, %v1195_v28  ;;  %v932_v58 = vld [vmem:[#allocation2 + $0xda] sm:$0xff] }
  0x6d   :  { %1026 = vst.msk [vmem:[%s1893_s2 + $0x50] sm:$0xff] %vm24_vm0, %v994_v12  ;;  %v408_v61 = vadd.f32 %v376_v51, %v310_v1  ;;  %v213_v13 = vadd.f32 %v181_v35, %v1147_v4  ;;  %v279_v5 = vmul.f32 %v830_v3, %v1151_v8  ;;  %v964_v16 = vmul.f32 %v1239_v55, %v1561_v26 }
  0x6e   :  { %v897_v0 = vadd.f32 %v865_v42, %v799_v52  ;;  %v701_v15 = vadd.f32 %v669_v41, %v603_v10  ;;  %v572_v17 = vmul.f32 %v831_v59, %v1207_v36  ;;  %v377_v21 = vmul.f32 %v1521_v11, %v1164_v14  ;;  %v834_v42 = vld [vmem:[#allocation2 + $0xd9] sm:$0xff] }
  0x6f   :  { %v506_v53 = vadd.f32 %v474_v43, %v408_v61  ;;  %v311_v20 = vadd.f32 %v279_v5, %v213_v13  ;;  %v182_v62 = vmul.f32 %v733_v9, %v1149_v6  ;;  %v670_v3 = vmul.f32 %v1538_v37, %v1220_v45  ;;  %v835_v61 = vld [vmem:[#allocation2 + $0xe1] sm:$0xff] }
  0x70   :  { %v995_v32 = vadd.f32 %v963_v46, %v897_v0  ;;  %v800_v23 = vadd.f32 %v768_v7, %v701_v15  ;;  %v475_v24 = vmul.f32 %v734_v47, %v1195_v28  ;;  %v280_v27 = vmul.f32 %v831_v59, %v1151_v8 }
  0x71   :  { %v604_v33 = vadd.f32 %v572_v17, %v506_v53  ;;  %v409_v34 = vadd.f32 %v377_v21, %v311_v20  ;;  %v214_v18 = vadd.f32 %v182_v62, %v1147_v4  ;;  %v769_v9 = vmul.f32 %v1229_v50, %v735_v19  ;;  %v933_v17 = vld [vmem:[#allocation2 + $0xe2] sm:$0xff] }
  0x72   :  { %1027 = vst.msk [vmem:[%s1893_s2 + $0x58] sm:$0xff] %vm24_vm0, %v995_v32  ;;  %v898_v11 = vadd.f32 %v866_v31, %v800_v23  ;;  %v867_v38 = vmul.f32 %v1236_v54, %v833_v2  ;;  %v573_v22 = vmul.f32 %v1553_v48, %v1207_v36  ;;  %v378_v59 = vmul.f32 %v1538_v37, %v1164_v14  ;;  %v737_v31 = vld [vmem:[#allocation2 + $0xe0] sm:$0xff] }
  0x73   :  { %v702_v39 = vadd.f32 %v670_v3, %v604_v33  ;;  %v507_v40 = vadd.f32 %v475_v24, %v409_v34  ;;  %v312_v44 = vadd.f32 %v280_v27, %v214_v18  ;;  %v965_v25 = vmul.f32 %v1239_v55, %v931_v57  ;;  %v738_v33 = vld [vmem:[#allocation2 + $0xf0] sm:$0xff] }
  0x74   :  { %v996_v29 = vadd.f32 %v964_v16, %v898_v11  ;;  %v671_v46 = vmul.f32 %v1561_v26, %v1220_v45  ;;  %v183_v30 = vmul.f32 %v734_v47, %v1149_v6  ;;  %v476_v41 = vmul.f32 %v735_v19, %v1195_v28 }
  0x75   :  { %v801_v49 = vadd.f32 %v769_v9, %v702_v39  ;;  %v605_v56 = vadd.f32 %v573_v22, %v507_v40  ;;  %v410_v63 = vadd.f32 %v378_v59, %v312_v44  ;;  %v770_v37 = vmul.f32 %v1229_v50, %v736_v60  ;;  %v836_v9 = vld [vmem:[#allocation2 + $0xf1] sm:$0xff] }
  0x76   :  { %1028 = vst.msk [vmem:[%s1893_s2 + $0x60] sm:$0xff] %vm24_vm0, %v996_v29  ;;  %v868_v12 = vmul.f32 %v1236_v54, %v834_v42  ;;  %v215_v1 = vadd.f32 %v183_v30, %v1147_v4  ;;  %v281_v47 = vmul.f32 %v1553_v48, %v1151_v8  ;;  %v574_v10 = vmul.f32 %v833_v2, %v1207_v36  ;;  %v934_v40 = vld [vmem:[#allocation2 + $0xf2] sm:$0xff] }
  0x77   :  { %v899_v51 = vadd.f32 %v867_v38, %v801_v49  ;;  %v703_v35 = vadd.f32 %v671_v46, %v605_v56  ;;  %v508_v52 = vadd.f32 %v476_v41, %v410_v63  ;;  %v966_v7 = vmul.f32 %v1239_v55, %v932_v58  ;;  %v739_v63 = vld [vmem:[#allocation2 + $0xf8] sm:$0xff] }
  0x78   :  { %v313_v43 = vadd.f32 %v281_v47, %v215_v1  ;;  %v379_v13 = vmul.f32 %v1561_v26, %v1164_v14  ;;  %v184_v5 = vmul.f32 %v735_v19, %v1149_v6  ;;  %v672_v48 = vmul.f32 %v931_v57, %v1220_v45  ;;  %v1641_v41 = vld [vmem:[#allocation2 + $0xf9] sm:$0xff] }
  0x79   :  { %v997_v0 = vadd.f32 %v965_v25, %v899_v51  ;;  %v802_v15 = vadd.f32 %v770_v37, %v703_v35  ;;  %v606_v16 = vadd.f32 %v574_v10, %v508_v52  ;;  %v477_v20 = vmul.f32 %v736_v60, %v1195_v28 }
  0x7a   :  { %v411_v53 = vadd.f32 %v379_v13, %v313_v43  ;;  %v216_v21 = vadd.f32 %v184_v5, %v1147_v4  ;;  %v282_v62 = vmul.f32 %v833_v2, %v1151_v8  ;;  %v771_v32 = vmul.f32 %v1229_v50, %v737_v31 }
  0x7b   :  { %1029 = vst.msk [vmem:[%s1893_s2 + $0x68] sm:$0xff] %vm24_vm0, %v997_v0  ;;  %v900_v26 = vadd.f32 %v868_v12, %v802_v15  ;;  %v704_v19 = vadd.f32 %v672_v48, %v606_v16  ;;  %v869_v23 = vmul.f32 %v1236_v54, %v835_v61  ;;  %v575_v24 = vmul.f32 %v834_v42, %v1207_v36  ;;  %v740_v15 = vld [vmem:[#allocation2 + $0x108] sm:$0xff] }
  0x7c   :  { %v509_v3 = vadd.f32 %v477_v20, %v411_v53  ;;  %v314_v34 = vadd.f32 %v282_v62, %v216_v21  ;;  %v380_v18 = vmul.f32 %v931_v57, %v1164_v14  ;;  %v967_v11 = vmul.f32 %v1239_v55, %v933_v17 }
  0x7d   :  { %v998_v27 = vadd.f32 %v966_v7, %v900_v26  ;;  %v803_v2 = vadd.f32 %v771_v32, %v704_v19  ;;  %v185_v38 = vmul.f32 %v736_v60, %v1149_v6  ;;  %v673_v39 = vmul.f32 %v932_v58, %v1220_v45  ;;  %v838_v19 = vld [vmem:[#allocation2 + $0x109] sm:$0xff] }
  0x7e   :  { %v607_v22 = vadd.f32 %v575_v24, %v509_v3  ;;  %v412_v44 = vadd.f32 %v380_v18, %v314_v34  ;;  %v478_v59 = vmul.f32 %v737_v31, %v1195_v28  ;;  %v772_v29 = vmul.f32 %v1229_v50, %v738_v33  ;;  %v1663_v32 = vld [vmem:[#allocation2 + $0x10a] sm:$0xff] }
  0x7f   :  { %1030 = vst.msk [vmem:[%s1893_s2 + $0x70] sm:$0xff] %vm24_vm0, %v998_v27  ;;  %v901_v57 = vadd.f32 %v869_v23, %v803_v2  ;;  %v217_v25 = vadd.f32 %v185_v38, %v1147_v4  ;;  %v283_v46 = vmul.f32 %v834_v42, %v1151_v8  ;;  %v870_v30 = vmul.f32 %v1236_v54, %v836_v9  ;;  %v1646_v42 = vld [vmem:[#allocation2 + $0xfa] sm:$0xff]  ;;  %v741_v2 = vld [vmem:[#allocation2 + $0x110] sm:$0xff] }
  0x80   :  { %v705_v60 = vadd.f32 %v673_v39, %v607_v22  ;;  %v510_v49 = vadd.f32 %v478_v59, %v412_v44  ;;  %v576_v56 = vmul.f32 %v835_v61, %v1207_v36  ;;  %v968_v12 = vmul.f32 %v1239_v55, %v934_v40  ;;  %v839_v59 = vld [vmem:[#allocation2 + $0x111] sm:$0xff] }
  0x81   :  { %v999_v37 = vadd.f32 %v967_v11, %v901_v57  ;;  %v315_v1 = vadd.f32 %v283_v46, %v217_v25  ;;  %v381_v47 = vmul.f32 %v932_v58, %v1164_v14  ;;  %v674_v52 = vmul.f32 %v933_v17, %v1220_v45  ;;  %v1680_v25 = vld [vmem:[#allocation2 + $0x112] sm:$0xff] }
  0x82   :  { %v804_v51 = vadd.f32 %v772_v29, %v705_v60  ;;  %v608_v35 = vadd.f32 %v576_v56, %v510_v49  ;;  %v186_v10 = vmul.f32 %v737_v31, %v1149_v6  ;;  %v773_v7 = vmul.f32 %v1229_v50, %v739_v63 }
  0x83   :  { %1031 = vst.msk [vmem:[%s1893_s2 + $0x78] sm:$0xff] %vm24_vm0, %v999_v37  ;;  %v871_v43 = vmul.f32 %v1236_v54, %v1641_v41  ;;  %v413_v13 = vadd.f32 %v381_v47, %v315_v1  ;;  %v479_v58 = vmul.f32 %v738_v33, %v1195_v28  ;;  %v284_v31 = vmul.f32 %v835_v61, %v1151_v8 }
  0x84   :  { %v902_v5 = vadd.f32 %v870_v30, %v804_v51  ;;  %v706_v0 = vadd.f32 %v674_v52, %v608_v35  ;;  %v218_v16 = vadd.f32 %v186_v10, %v1147_v4  ;;  %v969_v48 = vmul.f32 %v1239_v55, %v1646_v42  ;;  %v742_v35 = vld [vmem:[#allocation2 + $0x120] sm:$0xff] }
  0x85   :  { %v511_v53 = vadd.f32 %v479_v58, %v413_v13  ;;  %v577_v20 = vmul.f32 %v836_v9, %v1207_v36  ;;  %v382_v21 = vmul.f32 %v933_v17, %v1164_v14  ;;  %v187_v3 = vmul.f32 %v738_v33, %v1149_v6  ;;  %v1695_v52 = vld [vmem:[#allocation2 + $0x121] sm:$0xff] }
  0x86   :  { %v1000_v62 = vadd.f32 %v968_v12, %v902_v5  ;;  %v805_v26 = vadd.f32 %v773_v7, %v706_v0  ;;  %v316_v23 = vadd.f32 %v284_v31, %v218_v16  ;;  %v675_v34 = vmul.f32 %v934_v40, %v1220_v45  ;;  %v1703_v0 = vld [vmem:[#allocation2 + $0x122] sm:$0xff] }
  0x87   :  { %v609_v24 = vadd.f32 %v577_v20, %v511_v53  ;;  %v774_v61 = vmul.f32 %v1229_v50, %v740_v15  ;;  %v480_v18 = vmul.f32 %v739_v63, %v1195_v28  ;;  %v219_v11 = vadd.f32 %v187_v3, %v1147_v4 }
  0x88   :  { %1032 = vst.msk [vmem:[%s1893_s2 + $0x80] sm:$0xff] %vm24_vm0, %v1000_v62  ;;  %v903_v17 = vadd.f32 %v871_v43, %v805_v26  ;;  %v414_v27 = vadd.f32 %v382_v21, %v316_v23  ;;  %v285_v38 = vmul.f32 %v836_v9, %v1151_v8  ;;  %v872_v22 = vmul.f32 %v1236_v54, %v838_v19 }
  0x89   :  { %v707_v33 = vadd.f32 %v675_v34, %v609_v24  ;;  %v970_v39 = vmul.f32 %v1239_v55, %v1663_v32  ;;  %v578_v44 = vmul.f32 %v1641_v41, %v1207_v36  ;;  %v383_v60 = vmul.f32 %v934_v40, %v1164_v14 }
  0x8a   :  { %v1001_v57 = vadd.f32 %v969_v48, %v903_v17  ;;  %v512_v29 = vadd.f32 %v480_v18, %v414_v27  ;;  %v317_v46 = vadd.f32 %v285_v38, %v219_v11  ;;  %v676_v9 = vmul.f32 %v1646_v42, %v1220_v45  ;;  %v743_v18 = vld [vmem:[#allocation2 + $0x128] sm:$0xff] }
  0x8b   :  { %v806_v30 = vadd.f32 %v774_v61, %v707_v33  ;;  %v775_v49 = vmul.f32 %v1229_v50, %v741_v2  ;;  %v188_v56 = vmul.f32 %v739_v63, %v1149_v6  ;;  %v873_v12 = vmul.f32 %v1236_v54, %v839_v59  ;;  %v841_v17 = vld [vmem:[#allocation2 + $0x129] sm:$0xff] }
  0x8c   :  { %1033 = vst.msk [vmem:[%s1893_s2 + $0x88] sm:$0xff] %vm24_vm0, %v1001_v57  ;;  %v610_v37 = vadd.f32 %v578_v44, %v512_v29  ;;  %v415_v1 = vadd.f32 %v383_v60, %v317_v46  ;;  %v481_v47 = vmul.f32 %v740_v15, %v1195_v28  ;;  %v971_v51 = vmul.f32 %v1239_v55, %v1680_v25  ;;  %v939_v57 = vld [vmem:[#allocation2 + $0x12a] sm:$0xff] }
  0x8d   :  { %v904_v40 = vadd.f32 %v872_v22, %v806_v30  ;;  %v220_v63 = vadd.f32 %v188_v56, %v1147_v4  ;;  %v286_v10 = vmul.f32 %v1641_v41, %v1151_v8  ;;  %v579_v13 = vmul.f32 %v838_v19, %v1207_v36 }
  0x8e   :  { %v708_v7 = vadd.f32 %v676_v9, %v610_v37  ;;  %v513_v43 = vadd.f32 %v481_v47, %v415_v1  ;;  %v677_v58 = vmul.f32 %v1663_v32, %v1220_v45  ;;  %v384_v31 = vmul.f32 %v1646_v42, %v1164_v14  ;;  %v744_v37 = vld [vmem:[#allocation2 + $0x138] sm:$0xff] }
  0x8f   :  { %v1002_v5 = vadd.f32 %v970_v39, %v904_v40  ;;  %v318_v16 = vadd.f32 %v286_v10, %v220_v63  ;;  %v189_v48 = vmul.f32 %v740_v15, %v1149_v6  ;;  %v776_v41 = vmul.f32 %v1229_v50, %v742_v35 }
  0x90   :  { %v807_v53 = vadd.f32 %v775_v49, %v708_v7  ;;  %v611_v20 = vadd.f32 %v579_v13, %v513_v43  ;;  %v874_v21 = vmul.f32 %v1236_v54, %v1695_v52  ;;  %v482_v26 = vmul.f32 %v741_v2, %v1195_v28  ;;  %v940_v43 = vld [vmem:[#allocation2 + $0x13a] sm:$0xff] }
  0x91   :  { %1034 = vst.msk [vmem:[%s1893_s2 + $0x90] sm:$0xff] %vm24_vm0, %v1002_v5  ;;  %v416_v62 = vadd.f32 %v384_v31, %v318_v16  ;;  %v221_v23 = vadd.f32 %v189_v48, %v1147_v4  ;;  %v287_v42 = vmul.f32 %v838_v19, %v1151_v8  ;;  %v972_v24 = vmul.f32 %v1239_v55, %v1703_v0 }
  0x92   :  { %v905_v15 = vadd.f32 %v873_v12, %v807_v53  ;;  %v709_v3 = vadd.f32 %v677_v58, %v611_v20  ;;  %v580_v34 = vmul.f32 %v839_v59, %v1207_v36  ;;  %v385_v11 = vmul.f32 %v1663_v32, %v1164_v14  ;;  %v842_v12 = vld [vmem:[#allocation2 + $0x139] sm:$0xff] }
  0x93   :  { %v514_v61 = vadd.f32 %v482_v26, %v416_v62  ;;  %v319_v27 = vadd.f32 %v287_v42, %v221_v23  ;;  %v190_v38 = vmul.f32 %v741_v2, %v1149_v6  ;;  %v678_v19 = vmul.f32 %v1680_v25, %v1220_v45  ;;  %v843_v62 = vld [vmem:[#allocation2 + $0x141] sm:$0xff] }
  0x94   :  { %v1003_v33 = vadd.f32 %v971_v51, %v905_v15  ;;  %v808_v22 = vadd.f32 %v776_v41, %v709_v3  ;;  %v483_v39 = vmul.f32 %v742_v35, %v1195_v28  ;;  %v288_v60 = vmul.f32 %v839_v59, %v1151_v8 }
  0x95   :  { %v612_v44 = vadd.f32 %v580_v34, %v514_v61  ;;  %v417_v29 = vadd.f32 %v385_v11, %v319_v27  ;;  %v222_v46 = vadd.f32 %v190_v38, %v1147_v4  ;;  %v777_v2 = vmul.f32 %v1229_v50, %v743_v18  ;;  %v941_v34 = vld [vmem:[#allocation2 + $0x142] sm:$0xff] }
  0x96   :  { %1035 = vst.msk [vmem:[%s1893_s2 + $0x98] sm:$0xff] %vm24_vm0, %v1003_v33  ;;  %v906_v32 = vadd.f32 %v874_v21, %v808_v22  ;;  %v875_v30 = vmul.f32 %v1236_v54, %v841_v17  ;;  %v581_v9 = vmul.f32 %v1695_v52, %v1207_v36  ;;  %v386_v59 = vmul.f32 %v1680_v25, %v1164_v14  ;;  %v745_v21 = vld [vmem:[#allocation2 + $0x140] sm:$0xff] }
  0x97   :  { %v710_v49 = vadd.f32 %v678_v19, %v612_v44  ;;  %v515_v56 = vadd.f32 %v483_v39, %v417_v29  ;;  %v320_v1 = vadd.f32 %v288_v60, %v222_v46  ;;  %v973_v40 = vmul.f32 %v1239_v55, %v939_v57  ;;  %v746_v44 = vld [vmem:[#allocation2 + $0x150] sm:$0xff] }
  0x98   :  { %v1004_v47 = vadd.f32 %v972_v24, %v906_v32  ;;  %v679_v51 = vmul.f32 %v1703_v0, %v1220_v45  ;;  %v191_v63 = vmul.f32 %v742_v35, %v1149_v6  ;;  %v484_v58 = vmul.f32 %v743_v18, %v1195_v28 }
  0x99   :  { %v809_v10 = vadd.f32 %v777_v2, %v710_v49  ;;  %v613_v7 = vadd.f32 %v581_v9, %v515_v56  ;;  %v418_v13 = vadd.f32 %v386_v59, %v320_v1  ;;  %v778_v25 = vmul.f32 %v1229_v50, %v744_v37  ;;  %v844_v2 = vld [vmem:[#allocation2 + $0x151] sm:$0xff] }
  0x9a   :  { %1036 = vst.msk [vmem:[%s1893_s2 + $0xa0] sm:$0xff] %vm24_vm0, %v1004_v47  ;;  %v876_v5 = vmul.f32 %v1236_v54, %v842_v12  ;;  %v223_v16 = vadd.f32 %v191_v63, %v1147_v4  ;;  %v289_v35 = vmul.f32 %v1695_v52, %v1151_v8  ;;  %v582_v20 = vmul.f32 %v841_v17, %v1207_v36  ;;  %v942_v56 = vld [vmem:[#allocation2 + $0x152] sm:$0xff] }
  0x9b   :  { %v907_v31 = vadd.f32 %v875_v30, %v809_v10  ;;  %v711_v48 = vadd.f32 %v679_v51, %v613_v7  ;;  %v516_v53 = vadd.f32 %v484_v58, %v418_v13  ;;  %v974_v41 = vmul.f32 %v1239_v55, %v940_v43  ;;  %v747_v13 = vld [vmem:[#allocation2 + $0x158] sm:$0xff] }
  0x9c   :  { %v321_v26 = vadd.f32 %v289_v35, %v223_v16  ;;  %v387_v23 = vmul.f32 %v1703_v0, %v1164_v14  ;;  %v192_v42 = vmul.f32 %v743_v18, %v1149_v6  ;;  %v680_v52 = vmul.f32 %v939_v57, %v1220_v45  ;;  %v1783_v58 = vld [vmem:[#allocation2 + $0x159] sm:$0xff] }
  0x9d   :  { %v1005_v15 = vadd.f32 %v973_v40, %v907_v31  ;;  %v810_v3 = vadd.f32 %v778_v25, %v711_v48  ;;  %v614_v24 = vadd.f32 %v582_v20, %v516_v53  ;;  %v485_v27 = vmul.f32 %v744_v37, %v1195_v28 }
  0x9e   :  { %v419_v61 = vadd.f32 %v387_v23, %v321_v26  ;;  %v224_v11 = vadd.f32 %v192_v42, %v1147_v4  ;;  %v290_v38 = vmul.f32 %v841_v17, %v1151_v8  ;;  %v779_v33 = vmul.f32 %v1229_v50, %v745_v21 }
  0x9f   :  { %1037 = vst.msk [vmem:[%s1893_s2 + $0xa8] sm:$0xff] %vm24_vm0, %v1005_v15  ;;  %v908_v0 = vadd.f32 %v876_v5, %v810_v3  ;;  %v712_v18 = vadd.f32 %v680_v52, %v614_v24  ;;  %v877_v22 = vmul.f32 %v1236_v54, %v843_v62  ;;  %v583_v39 = vmul.f32 %v842_v12, %v1207_v36  ;;  %v748_v3 = vld [vmem:[#allocation2 + $0x168] sm:$0xff] }
  0xa0   :  { %v517_v19 = vadd.f32 %v485_v27, %v419_v61  ;;  %v322_v29 = vadd.f32 %v290_v38, %v224_v11  ;;  %v388_v46 = vmul.f32 %v939_v57, %v1164_v14  ;;  %v975_v32 = vmul.f32 %v1239_v55, %v941_v34 }
  0xa1   :  { %v1006_v60 = vadd.f32 %v974_v41, %v908_v0  ;;  %v811_v17 = vadd.f32 %v779_v33, %v712_v18  ;;  %v193_v30 = vmul.f32 %v744_v37, %v1149_v6  ;;  %v681_v49 = vmul.f32 %v940_v43, %v1220_v45  ;;  %v846_v18 = vld [vmem:[#allocation2 + $0x169] sm:$0xff] }
  0xa2   :  { %v615_v9 = vadd.f32 %v583_v39, %v517_v19  ;;  %v420_v1 = vadd.f32 %v388_v46, %v322_v29  ;;  %v486_v59 = vmul.f32 %v745_v21, %v1195_v28  ;;  %v780_v47 = vmul.f32 %v1229_v50, %v746_v44  ;;  %v944_v33 = vld [vmem:[#allocation2 + $0x16a] sm:$0xff] }
  0xa3   :  { %1038 = vst.msk [vmem:[%s1893_s2 + $0xb0] sm:$0xff] %vm24_vm0, %v1006_v60  ;;  %v909_v57 = vadd.f32 %v877_v22, %v811_v17  ;;  %v225_v40 = vadd.f32 %v193_v30, %v1147_v4  ;;  %v291_v51 = vmul.f32 %v842_v12, %v1151_v8  ;;  %v878_v63 = vmul.f32 %v1236_v54, %v844_v2  ;;  %v1788_v12 = vld [vmem:[#allocation2 + $0x15a] sm:$0xff]  ;;  %v749_v17 = vld [vmem:[#allocation2 + $0x170] sm:$0xff] }
  0xa4   :  { %v713_v37 = vadd.f32 %v681_v49, %v615_v9  ;;  %v518_v10 = vadd.f32 %v486_v59, %v420_v1  ;;  %v584_v7 = vmul.f32 %v843_v62, %v1207_v36  ;;  %v976_v5 = vmul.f32 %v1239_v55, %v942_v56  ;;  %v847_v59 = vld [vmem:[#allocation2 + $0x171] sm:$0xff] }
  0xa5   :  { %v1007_v25 = vadd.f32 %v975_v32, %v909_v57  ;;  %v323_v16 = vadd.f32 %v291_v51, %v225_v40  ;;  %v389_v35 = vmul.f32 %v940_v43, %v1164_v14  ;;  %v682_v53 = vmul.f32 %v941_v34, %v1220_v45  ;;  %v945_v40 = vld [vmem:[#allocation2 + $0x172] sm:$0xff] }
  0xa6   :  { %v812_v31 = vadd.f32 %v780_v47, %v713_v37  ;;  %v616_v48 = vadd.f32 %v584_v7, %v518_v10  ;;  %v194_v20 = vmul.f32 %v745_v21, %v1149_v6  ;;  %v781_v41 = vmul.f32 %v1229_v50, %v747_v13 }
  0xa7   :  { %1039 = vst.msk [vmem:[%s1893_s2 + $0xb8] sm:$0xff] %vm24_vm0, %v1007_v25  ;;  %v879_v26 = vmul.f32 %v1236_v54, %v1783_v58  ;;  %v421_v23 = vadd.f32 %v389_v35, %v323_v16  ;;  %v487_v43 = vmul.f32 %v746_v44, %v1195_v28  ;;  %v292_v21 = vmul.f32 %v843_v62, %v1151_v8 }
  0xa8   :  { %v910_v42 = vadd.f32 %v878_v63, %v812_v31  ;;  %v714_v15 = vadd.f32 %v682_v53, %v616_v48  ;;  %v226_v24 = vadd.f32 %v194_v20, %v1147_v4  ;;  %v977_v52 = vmul.f32 %v1239_v55, %v1788_v12  ;;  %v750_v48 = vld [vmem:[#allocation2 + $0x180] sm:$0xff] }
  0xa9   :  { %v519_v61 = vadd.f32 %v487_v43, %v421_v23  ;;  %v585_v27 = vmul.f32 %v844_v2, %v1207_v36  ;;  %v390_v11 = vmul.f32 %v941_v34, %v1164_v14  ;;  %v195_v19 = vmul.f32 %v746_v44, %v1149_v6  ;;  %v848_v53 = vld [vmem:[#allocation2 + $0x181] sm:$0xff] }
  0xaa   :  { %v1008_v38 = vadd.f32 %v976_v5, %v910_v42  ;;  %v813_v0 = vadd.f32 %v781_v41, %v714_v15  ;;  %v324_v22 = vadd.f32 %v292_v21, %v226_v24  ;;  %v683_v29 = vmul.f32 %v942_v56, %v1220_v45 }
  0xab   :  { %v617_v39 = vadd.f32 %v585_v27, %v519_v61  ;;  %v782_v62 = vmul.f32 %v1229_v50, %v748_v3  ;;  %v488_v46 = vmul.f32 %v747_v13, %v1195_v28  ;;  %v227_v32 = vadd.f32 %v195_v19, %v1147_v4 }
  0xac   :  { %1040 = vst.msk [vmem:[%s1893_s2 + $0xc0] sm:$0xff] %vm24_vm0, %v1008_v38  ;;  %v911_v34 = vadd.f32 %v879_v26, %v813_v0  ;;  %v422_v60 = vadd.f32 %v390_v11, %v324_v22  ;;  %v293_v30 = vmul.f32 %v844_v2, %v1151_v8  ;;  %v880_v9 = vmul.f32 %v1236_v54, %v846_v18 }
  0xad   :  { %v715_v44 = vadd.f32 %v683_v29, %v617_v39  ;;  %v978_v49 = vmul.f32 %v1239_v55, %v944_v33  ;;  %v586_v1 = vmul.f32 %v1783_v58, %v1207_v36  ;;  %v391_v37 = vmul.f32 %v942_v56, %v1164_v14 }
  0xae   :  { %v1009_v57 = vadd.f32 %v977_v52, %v911_v34  ;;  %v520_v47 = vadd.f32 %v488_v46, %v422_v60  ;;  %v325_v51 = vadd.f32 %v293_v30, %v227_v32  ;;  %v684_v10 = vmul.f32 %v1788_v12, %v1220_v45  ;;  %v751_v46 = vld [vmem:[#allocation2 + $0x188] sm:$0xff] }
  0xaf   :  { %v814_v63 = vadd.f32 %v782_v62, %v715_v44  ;;  %v783_v2 = vmul.f32 %v1229_v50, %v749_v17  ;;  %v196_v7 = vmul.f32 %v747_v13, %v1149_v6  ;;  %v881_v5 = vmul.f32 %v1236_v54, %v847_v59 }
  0xb0   :  { %1041 = vst.msk [vmem:[%s1893_s2 + $0xc8] sm:$0xff] %vm24_vm0, %v1009_v57  ;;  %v618_v25 = vadd.f32 %v586_v1, %v520_v47  ;;  %v423_v16 = vadd.f32 %v391_v37, %v325_v51  ;;  %v489_v35 = vmul.f32 %v748_v3, %v1195_v28  ;;  %v979_v31 = vmul.f32 %v1239_v55, %v945_v40  ;;  %v849_v1 = vld [vmem:[#allocation2 + $0x189] sm:$0xff]  ;;  %v752_v37 = vld [vmem:[#allocation2 + $0x198] sm:$0xff] }
  0xb1   :  { %v912_v56 = vadd.f32 %v880_v9, %v814_v63  ;;  %v228_v20 = vadd.f32 %v196_v7, %v1147_v4  ;;  %v294_v13 = vmul.f32 %v1783_v58, %v1151_v8  ;;  %v587_v23 = vmul.f32 %v846_v18, %v1207_v36  ;;  %v946_v58 = vld [vmem:[#allocation2 + $0x182] sm:$0xff] }
  0xb2   :  { %v716_v41 = vadd.f32 %v684_v10, %v618_v25  ;;  %v521_v26 = vadd.f32 %v489_v35, %v423_v16  ;;  %v685_v43 = vmul.f32 %v944_v33, %v1220_v45  ;;  %v392_v24 = vmul.f32 %v1788_v12, %v1164_v14 }
  0xb3   :  { %v1010_v42 = vadd.f32 %v978_v49, %v912_v56  ;;  %v326_v15 = vadd.f32 %v294_v13, %v228_v20  ;;  %v197_v21 = vmul.f32 %v748_v3, %v1149_v6  ;;  %v784_v27 = vmul.f32 %v1229_v50, %v750_v48 }
  0xb4   :  { %v815_v52 = vadd.f32 %v783_v2, %v716_v41  ;;  %v619_v61 = vadd.f32 %v587_v23, %v521_v26  ;;  %v882_v11 = vmul.f32 %v1236_v54, %v848_v53  ;;  %v490_v0 = vmul.f32 %v749_v17, %v1195_v28  ;;  %v947_v2 = vld [vmem:[#allocation2 + $0x18a] sm:$0xff]  ;;  %v948_v26 = vld [vmem:[#allocation2 + $0x19a] sm:$0xff] }
  0xb5   :  { %1042 = vst.msk [vmem:[%s1893_s2 + $0xd0] sm:$0xff] %vm24_vm0, %v1010_v42  ;;  %v424_v38 = vadd.f32 %v392_v24, %v326_v15  ;;  %v229_v22 = vadd.f32 %v197_v21, %v1147_v4  ;;  %v295_v12 = vmul.f32 %v846_v18, %v1151_v8  ;;  %v588_v39 = vmul.f32 %v847_v59, %v1207_v36  ;;  %v851_v21 = vld [vmem:[#allocation2 + $0x1a1] sm:$0xff] }
  0xb6   :  { %v913_v3 = vadd.f32 %v881_v5, %v815_v52  ;;  %v717_v19 = vadd.f32 %v685_v43, %v619_v61  ;;  %v393_v29 = vmul.f32 %v944_v33, %v1164_v14  ;;  %v491_v60 = vmul.f32 %v750_v48, %v1195_v28 }
  0xb7   :  { %v522_v62 = vadd.f32 %v490_v0, %v424_v38  ;;  %v327_v34 = vadd.f32 %v295_v12, %v229_v22  ;;  %v198_v32 = vmul.f32 %v749_v17, %v1149_v6  ;;  %v980_v9 = vmul.f32 %v1239_v55, %v946_v58 }
  0xb8   :  { %v1011_v30 = vadd.f32 %v979_v31, %v913_v3  ;;  %v816_v44 = vadd.f32 %v784_v27, %v717_v19  ;;  %v686_v49 = vmul.f32 %v945_v40, %v1220_v45  ;;  %v296_v33 = vmul.f32 %v847_v59, %v1151_v8  ;;  %v850_v31 = vld [vmem:[#allocation2 + $0x199] sm:$0xff]  ;;  %v949_v27 = vld [vmem:[#allocation2 + $0x1a2] sm:$0xff] }
  0xb9   :  { %v620_v18 = vadd.f32 %v588_v39, %v522_v62  ;;  %v425_v57 = vadd.f32 %v393_v29, %v327_v34  ;;  %v230_v47 = vadd.f32 %v198_v32, %v1147_v4  ;;  %v785_v6 = vmul.f32 %v1229_v50, %v751_v46 }
  0xba   :  { %1043 = vst.msk [vmem:[%s1893_s2 + $0xd8] sm:$0xff] %vm24_vm0, %v1011_v30  ;;  %v914_v51 = vadd.f32 %v882_v11, %v816_v44  ;;  %v589_v17 = vmul.f32 %v848_v53, %v1207_v36  ;;  %v394_v63 = vmul.f32 %v945_v40, %v1164_v14  ;;  %v492_v4 = vmul.f32 %v751_v46, %v1195_v28  ;;  %v753_v40 = vld [vmem:[#allocation2 + $0x1a0] sm:$0xff] }
  0xbb   :  { %v718_v10 = vadd.f32 %v686_v49, %v620_v18  ;;  %v523_v7 = vadd.f32 %v491_v60, %v425_v57  ;;  %v328_v25 = vadd.f32 %v296_v33, %v230_v47  ;;  %v883_v59 = vmul.f32 %v1236_v54, %v849_v1 }
  0xbc   :  { %v1012_v8 = vadd.f32 %v980_v9, %v914_v51  ;;  %v687_v5 = vmul.f32 %v946_v58, %v1220_v45  ;;  %v786_v56 = vmul.f32 %v1229_v50, %v752_v37  ;;  %v981_v14 = vmul.f32 %v1239_v55, %v947_v2 }
  0xbd   :  { %v817_v16 = vadd.f32 %v785_v6, %v718_v10  ;;  %v621_v35 = vadd.f32 %v589_v17, %v523_v7  ;;  %v426_v48 = vadd.f32 %v394_v63, %v328_v25  ;;  %v590_v13 = vmul.f32 %v849_v1, %v1207_v36 }
  0xbe   :  { %1044 = vst.msk [vmem:[%s1893_s2 + $0xe0] sm:$0xff] %vm24_vm0, %v1012_v8  ;;  %v884_v41 = vmul.f32 %v1236_v54, %v850_v31  ;;  %v688_v23 = vmul.f32 %v947_v2, %v1220_v45  ;;  %v787_v24 = vmul.f32 %v1229_v50, %v753_v40  ;;  %v982_v61 = vmul.f32 %v1239_v55, %v948_v26 }
  0xbf   :  { %v915_v28 = vadd.f32 %v883_v59, %v817_v16  ;;  %v719_v53 = vadd.f32 %v687_v5, %v621_v35  ;;  %v524_v20 = vadd.f32 %v492_v4, %v426_v48  ;;  %v885_v45 = vmul.f32 %v1236_v54, %v851_v21 }
  0xc0   :  { %v983_v38 = vmul.f32 %v1239_v55, %v949_v27 }
  0xc1   :  { %v1013_v43 = vadd.f32 %v981_v14, %v915_v28  ;;  %v818_v42 = vadd.f32 %v786_v56, %v719_v53  ;;  %v622_v15 = vadd.f32 %v590_v13, %v524_v20 }
  0xc3   :  { %1045 = vst.msk [vmem:[%s1893_s2 + $0xe8] sm:$0xff] %vm24_vm0, %v1013_v43  ;;  %v916_v52 = vadd.f32 %v884_v41, %v818_v42  ;;  %v720_v36 = vadd.f32 %v688_v23, %v622_v15 }
  0xc5   :  { %v1014_v11 = vadd.f32 %v982_v61, %v916_v52  ;;  %v819_v58 = vadd.f32 %v787_v24, %v720_v36 }
  0xc7   :  { %1046 = vst.msk [vmem:[%s1893_s2 + $0xf0] sm:$0xff] %vm24_vm0, %v1014_v11  ;;  %v917_v50 = vadd.f32 %v885_v45, %v819_v58 }
  0xc9   :  { %v1015_v0 = vadd.f32 %v983_v38, %v917_v50 }
  0xcb   :  { %1047 = vst.msk [vmem:[%s1893_s2 + $0xf8] sm:$0xff] %vm24_vm0, %v1015_v0 }
  0xcc   :  { %1052 = vsyncpa [#allocation4], 1 }

</bundles_post_ra>
